<compile_context>
chip_gen: v6e
topology: v6e:2x2x1
jax: 0.10.0
libtpu: 0.0.40
codegen_flags: <defaults>
</compile_context>

<pallas_src>
import functools

import jax
import jax.numpy as jnp
from jax.experimental import pallas as pl
from jax.experimental.pallas import tpu as pltpu

EPS = 1e-5
HID = 28      # block input/output width  (Linear(28, 64) ... Linear(64, 28))
MID = 64      # block hidden width
LANE = 128    # lane-padded feature width used inside the kernel


# ----------------------------------------------------------------------------
# Kernel
# ----------------------------------------------------------------------------
def mlp_decoder_kernel(x_ref, aff_ref, vecs_ref, wout_ref, w1_ref, w2_ref,
                       o_ref, *, n_block):
    # Block shapes: x_ref (1, B, Z), o_ref (1, B, LANE); weights full-resident.
    B = x_ref.shape[1]
    inv_b = jnp.float32(1.0 / B)
    mm_dtype = wout_ref.dtype

    def vec(row):
        # Static (1, LANE) view into the packed vector slab (zero-cost).
        return vecs_ref[row:row + 1, :]

    def bn_scale_offset(h, gamma, beta):
        # Folded training-mode BN: one-pass sum / sum-of-squares statistics,
        # var = E[h^2] - mu^2 (clamped at 0), applied later as one FMA pass.
        s1 = jnp.sum(h, axis=0, keepdims=True)
        s2 = jnp.sum(h * h, axis=0, keepdims=True)
        mu = s1 * inv_b
        var = jnp.maximum(s2 * inv_b - mu * mu, 0.0)
        inv = jax.lax.rsqrt(var + EPS)
        s = gamma * inv
        o = beta - mu * s
        return s, o

    x = x_ref[0].astype(jnp.float32)                       # (B, Z) native K

    # input_norm (folded) -> output_layer (+ b_out, which is NOT followed by BN)
    s_in, o_in = bn_scale_offset(x, aff_ref[0:1, :], aff_ref[1:2, :])
    h = x * s_in + o_in
    h = jnp.dot(h.astype(mm_dtype), wout_ref[...],
                preferred_element_type=jnp.float32) + vec(0)

    prev = h
    # residual blocks: Linear(28,64) -> BN(64) -> ReLU -> Linear(64,28) -> BN(28)
    for b in range(n_block):                               # static -> unrolled
        base = 1 + 4 * b
        # Linear biases are dropped: they cancel exactly in training-mode BN.
        t = jnp.dot(prev.astype(mm_dtype), w1_ref[b],
                    preferred_element_type=jnp.float32)
        s1_, o1_ = bn_scale_offset(t, vec(base + 0), vec(base + 1))
        t = jnp.maximum(t * s1_ + o1_, 0.0)
        t = jnp.dot(t.astype(mm_dtype), w2_ref[b],
                    preferred_element_type=jnp.float32)
        s2_, o2_ = bn_scale_offset(t, vec(base + 2), vec(base + 3))
        # fold the residual add into the BN application
        prev = prev + t * s2_ + o2_

    o_ref[0] = prev.astype(o_ref.dtype)                    # lane-dense store


# ----------------------------------------------------------------------------
# Parameter packing — call ONCE when params change (hoisted out of hot path).
# ----------------------------------------------------------------------------
def pack_params(params, *, n_block, weight_dtype=jnp.bfloat16):
    def pad_vec(v):                       # (n,) -> (1, LANE), zero-padded
        return jnp.pad(v, (0, LANE - v.shape[-1]))[None, :]

    def pad_cols(w):                      # (in, out) -> (in, LANE)
        return jnp.pad(w, ((0, 0), (0, LANE - w.shape[1])))

    def pad_mat(w):                       # (in, out) -> (LANE, LANE)
        return jnp.pad(w, ((0, LANE - w.shape[0]), (0, LANE - w.shape[1])))

    # Input BN affine kept at native z_dim width (matches the unpadded x).
    in_aff = jnp.stack([params["in_gamma"], params["in_beta"]]
                       ).astype(jnp.float32)                # (2, z_dim)

    # Packed vector slab: b_out, then per block (g1, be1, g2, be2).
    # b1 / b2 are intentionally omitted (cancel exactly in training-mode BN).
    rows = [pad_vec(params["b_out"])]
    for b in range(n_block):
        rows += [pad_vec(params["g1"][b]), pad_vec(params["be1"][b]),
                 pad_vec(params["g2"][b]), pad_vec(params["be2"][b])]
    vecs = jnp.concatenate(rows, axis=0).astype(jnp.float32)  # (1+4n, LANE)

    w_out = pad_cols(params["w_out"]).astype(weight_dtype)     # (z_dim, LANE)
    w1 = jnp.stack([pad_mat(params["w1"][b]) for b in range(n_block)]
                   ).astype(weight_dtype)                      # (n, LANE, LANE)
    w2 = jnp.stack([pad_mat(params["w2"][b]) for b in range(n_block)]
                   ).astype(weight_dtype)
    return in_aff, vecs, w_out, w1, w2


def _const_map(nd):
    return lambda g: (0,) * nd


# ----------------------------------------------------------------------------
# Forward wrapper (jitted; takes pre-packed params — no per-call packing ops)
# ----------------------------------------------------------------------------
@functools.partial(jax.jit, static_argnames=("n_block",))
def mlp_decoder_forward(x, in_aff, vecs, w_out, w1, w2, *, n_block):
    squeeze = (x.ndim == 2)
    x3 = x[None] if squeeze else x            # (G, B, Z); each group = 1 batch
    x3 = x3.astype(jnp.float32)
    G, B, Z = x3.shape

    kernel = functools.partial(mlp_decoder_kernel, n_block=n_block)
    args = (x3, in_aff, vecs, w_out, w1, w2)

    w_itemsize = jnp.dtype(w_out.dtype).itemsize
    w_bytes = (w_out.size + w1.size + w2.size) * w_itemsize \
        + (vecs.size + in_aff.size) * 4
    x_blk = B * Z * 4
    out_blk = B * LANE * 4

    # Explicit VMEM budget: double-buffered in/out blocks + resident weights
    # + activation headroom, capped at v7x's 64 MiB physical VMEM.
    est = 2 * (x_blk + out_blk) + 2 * w_bytes + 8 * B * LANE * 4 + (2 << 20)
    vmem_limit = min(64 << 20, max(32 << 20, int(est)))

    cost = pl.CostEstimate(
        flops=int(G * 2 * B * (Z * LANE + 2 * n_block * LANE * LANE)),
        transcendentals=int(G * (1 + 2 * n_block) * LANE),   # rsqrt per BN lane
        bytes_accessed=int(x3.size * 4 + G * B * LANE * 4 + w_bytes),
    )

    out = pl.pallas_call(
        kernel,
        out_shape=jax.ShapeDtypeStruct((G, B, LANE), jnp.float32),
        grid_spec=pltpu.PrefetchScalarGridSpec(
            num_scalar_prefetch=0,
            grid=(G,),
            in_specs=[
                pl.BlockSpec((1, B, Z), lambda g: (g, 0, 0)),     # per-group x
                pl.BlockSpec(in_aff.shape, _const_map(in_aff.ndim)),
                pl.BlockSpec(vecs.shape, _const_map(vecs.ndim)),
                pl.BlockSpec(w_out.shape, _const_map(w_out.ndim)),
                pl.BlockSpec(w1.shape, _const_map(w1.ndim)),
                pl.BlockSpec(w2.shape, _const_map(w2.ndim)),
            ],
            out_specs=pl.BlockSpec((1, B, LANE), lambda g: (g, 0, 0)),
        ),
        compiler_params=pltpu.CompilerParams(
            dimension_semantics=("parallel",),    # shards groups on v7x 2-TC
            vmem_limit_bytes=vmem_limit,
        ),
        cost_estimate=cost,
    )(*args)

    out = out[..., :HID]
    return out[0] if squeeze else out


# ----------------------------------------------------------------------------
# Synthetic parameters & pure-JAX reference (PyTorch training-mode BN semantics)
# ----------------------------------------------------------------------------
def init_params(key, z_dim, n_block):
    ks = jax.random.split(key, 12)
    s = 0.1
    return {
        "in_gamma": 1.0 + s * jax.random.normal(ks[0], (z_dim,), jnp.float32),
        "in_beta":  s * jax.random.normal(ks[1], (z_dim,), jnp.float32),
        "w_out": s * jax.random.normal(ks[2], (z_dim, HID), jnp.float32),
        "b_out": s * jax.random.normal(ks[3], (HID,), jnp.float32),
        "w1":  s * jax.random.normal(ks[4], (n_block, HID, MID), jnp.float32),
        "b1":  s * jax.random.normal(ks[5], (n_block, MID), jnp.float32),
        "g1":  1.0 + s * jax.random.normal(ks[6], (n_block, MID), jnp.float32),
        "be1": s * jax.random.normal(ks[7], (n_block, MID), jnp.float32),
        "w2":  s * jax.random.normal(ks[8], (n_block, MID, HID), jnp.float32),
        "b2":  s * jax.random.normal(ks[9], (n_block, HID), jnp.float32),
        "g2":  1.0 + s * jax.random.normal(ks[10], (n_block, HID), jnp.float32),
        "be2": s * jax.random.normal(ks[11], (n_block, HID), jnp.float32),
    }


def _bn_ref(h, gamma, beta):
    mu = jnp.mean(h, axis=0, keepdims=True)
    var = jnp.mean((h - mu) ** 2, axis=0, keepdims=True)
    return (h - mu) * jax.lax.rsqrt(var + EPS) * gamma + beta


def reference_forward(x, params, *, n_block):
    h = _bn_ref(x, params["in_gamma"], params["in_beta"])
    h = h @ params["w_out"] + params["b_out"]
    prev = h
    for b in range(n_block):
        t = prev @ params["w1"][b] + params["b1"][b]
        t = _bn_ref(t, params["g1"][b], params["be1"][b])
        t = jnp.maximum(t, 0.0)
        t = t @ params["w2"][b] + params["b2"][b]
        t = _bn_ref(t, params["g2"][b], params["be2"][b])
        prev = prev + t
    return prev


# ----------------------------------------------------------------------------
if __name__ == "__main__":
    key = jax.random.PRNGKey(0)
    k_x, k_p, k_g = jax.random.split(key, 3)

    B = 64        # whole batch resident per grid step (full-batch BN)
    Z_DIM = 32    # z_dim (state_dim)
    N_BLOCK = 3

    x = jax.random.normal(k_x, (B, Z_DIM), jnp.float32)
    params = init_params(k_p, Z_DIM, N_BLOCK)
    ref = reference_forward(x, params, n_block=N_BLOCK)

    # Pack ONCE (hoisted out of the hot path). bf16 weights by default.
    packed_bf16 = pack_params(params, n_block=N_BLOCK)
    out = mlp_decoder_forward(x, *packed_bf16, n_block=N_BLOCK)
    out = jax.block_until_ready(out)
    assert out.shape == (B, HID)
    assert jnp.allclose(out, ref, atol=2e-1, rtol=1e-1), \
        "bf16-weight kernel mismatch vs pure-JAX reference"

    # f32 weight path stays selectable (training-accuracy needs).
    packed_f32 = pack_params(params, n_block=N_BLOCK, weight_dtype=jnp.float32)
    out_f32 = jax.block_until_ready(
        mlp_decoder_forward(x, *packed_f32, n_block=N_BLOCK))
    assert out_f32.shape == (B, HID)
    assert jnp.allclose(out_f32, ref, atol=5e-4, rtol=5e-4), \
        "f32 kernel mismatch vs pure-JAX reference"

    # Multi-group path: grid=(G,), weights VMEM-resident, group axis "parallel".
    G = 2
    xg = jax.random.normal(k_g, (G, B, Z_DIM), jnp.float32)
    outg = jax.block_until_ready(
        mlp_decoder_forward(xg, *packed_f32, n_block=N_BLOCK))
    refg = jnp.stack([reference_forward(xg[g], params, n_block=N_BLOCK)
                      for g in range(G)])
    assert outg.shape == (G, B, HID)
    assert jnp.allclose(outg, refg, atol=5e-4, rtol=5e-4), \
        "multi-group kernel mismatch vs pure-JAX reference"

    print("KERNEL_OK")
</pallas_src>

<mosaic_0001>
module attributes {stable_mosaic.version = 11 : i64} {
  func.func @mlp_decoder_kernel(%arg0: i32, %arg1: memref<1x64x32xf32, #tpu.memory_space<vmem>>, %arg2: memref<2x32xf32, #tpu.memory_space<vmem>>, %arg3: memref<13x128xf32, #tpu.memory_space<vmem>>, %arg4: memref<32x128xbf16, #tpu.memory_space<vmem>>, %arg5: memref<3x128x128xbf16, #tpu.memory_space<vmem>>, %arg6: memref<3x128x128xbf16, #tpu.memory_space<vmem>>, %arg7: memref<1x64x128xf32, #tpu.memory_space<vmem>>) attributes {dimension_semantics = [#tpu.dimension_semantics<parallel>], iteration_bounds = array<i64: 1>, scalar_prefetch = 0 : i64, scratch_operands = 0 : i64, tpu.core_type = #tpu.core_type<tc>, window_params = [{transform_indices = @transform_0, window_bounds = array<i64: 1, 64, 32>}, {pipeline_mode = #tpu.pipeline_mode<synchronous>, transform_indices = @transform_1, window_bounds = array<i64: 2, 32>}, {pipeline_mode = #tpu.pipeline_mode<synchronous>, transform_indices = @transform_2, window_bounds = array<i64: 13, 128>}, {pipeline_mode = #tpu.pipeline_mode<synchronous>, transform_indices = @transform_3, window_bounds = array<i64: 32, 128>}, {pipeline_mode = #tpu.pipeline_mode<synchronous>, transform_indices = @transform_4, window_bounds = array<i64: 3, 128, 128>}, {pipeline_mode = #tpu.pipeline_mode<synchronous>, transform_indices = @transform_5, window_bounds = array<i64: 3, 128, 128>}, {transform_indices = @transform_6, window_bounds = array<i64: 1, 64, 128>}]} {
    %c0 = arith.constant 0 : index
    %c0_0 = arith.constant 0 : index
    %c0_1 = arith.constant 0 : index
    %0 = vector.load %arg1[%c0, %c0_0, %c0_1] : memref<1x64x32xf32, #tpu.memory_space<vmem>>, vector<1x64x32xf32>
    %1 = vector.shape_cast %0 : vector<1x64x32xf32> to vector<64x32xf32>
    %c0_2 = arith.constant 0 : index
    %c0_3 = arith.constant 0 : index
    %2 = vector.load %arg2[%c0_2, %c0_3] : memref<2x32xf32, #tpu.memory_space<vmem>>, vector<1x32xf32>
    %c1 = arith.constant 1 : index
    %c0_4 = arith.constant 0 : index
    %3 = vector.load %arg2[%c1, %c0_4] : memref<2x32xf32, #tpu.memory_space<vmem>>, vector<1x32xf32>
    %cst = arith.constant dense<0.000000e+00> : vector<32xf32>
    %4 = vector.multi_reduction <add>, %1, %cst [0] : vector<64x32xf32> to vector<32xf32>
    %5 = vector.shape_cast %4 : vector<32xf32> to vector<1x32xf32>
    %6 = arith.mulf %1, %1 : vector<64x32xf32>
    %cst_5 = arith.constant dense<0.000000e+00> : vector<32xf32>
    %7 = vector.multi_reduction <add>, %6, %cst_5 [0] : vector<64x32xf32> to vector<32xf32>
    %8 = vector.shape_cast %7 : vector<32xf32> to vector<1x32xf32>
    %cst_6 = arith.constant 1.562500e-02 : f32
    %9 = vector.broadcast %cst_6 : f32 to vector<1x32xf32>
    %10 = arith.mulf %5, %9 : vector<1x32xf32>
    %cst_7 = arith.constant 1.562500e-02 : f32
    %11 = vector.broadcast %cst_7 : f32 to vector<1x32xf32>
    %12 = arith.mulf %8, %11 : vector<1x32xf32>
    %13 = arith.mulf %10, %10 : vector<1x32xf32>
    %14 = arith.subf %12, %13 : vector<1x32xf32>
    %cst_8 = arith.constant 0.000000e+00 : f32
    %15 = vector.broadcast %cst_8 : f32 to vector<1x32xf32>
    %16 = arith.maximumf %14, %15 : vector<1x32xf32>
    %cst_9 = arith.constant 9.99999974E-6 : f32
    %17 = vector.broadcast %cst_9 : f32 to vector<1x32xf32>
    %18 = arith.addf %16, %17 : vector<1x32xf32>
    %19 = math.rsqrt %18 : vector<1x32xf32>
    %20 = arith.mulf %2, %19 : vector<1x32xf32>
    %21 = arith.mulf %10, %20 : vector<1x32xf32>
    %22 = arith.subf %3, %21 : vector<1x32xf32>
    %23 = vector.broadcast %20 : vector<1x32xf32> to vector<64x32xf32>
    %24 = arith.mulf %1, %23 : vector<64x32xf32>
    %25 = vector.broadcast %22 : vector<1x32xf32> to vector<64x32xf32>
    %26 = arith.addf %24, %25 : vector<64x32xf32>
    %27 = arith.truncf %26 : vector<64x32xf32> to vector<64x32xbf16>
    %c0_10 = arith.constant 0 : index
    %c0_11 = arith.constant 0 : index
    %28 = vector.load %arg4[%c0_10, %c0_11] : memref<32x128xbf16, #tpu.memory_space<vmem>>, vector<32x128xbf16>
    %cst_12 = arith.constant dense<0.000000e+00> : vector<64x128xf32>
    %29 = tpu.matmul %27, %28, %cst_12 {dimension_numbers = #tpu.dot_dimension_numbers<[1], [0], [0], [1], [0, 0, 1, 1], [], []>} : vector<64x32xbf16>, vector<32x128xbf16>, vector<64x128xf32> -> vector<64x128xf32>
    %c0_13 = arith.constant 0 : index
    %c0_14 = arith.constant 0 : index
    %30 = vector.load %arg3[%c0_13, %c0_14] : memref<13x128xf32, #tpu.memory_space<vmem>>, vector<1x128xf32>
    %31 = vector.broadcast %30 : vector<1x128xf32> to vector<64x128xf32>
    %32 = arith.addf %29, %31 : vector<64x128xf32>
    %33 = arith.truncf %32 : vector<64x128xf32> to vector<64x128xbf16>
    %c0_15 = arith.constant 0 : index
    %c0_16 = arith.constant 0 : index
    %c0_17 = arith.constant 0 : index
    %34 = vector.load %arg5[%c0_15, %c0_16, %c0_17] : memref<3x128x128xbf16, #tpu.memory_space<vmem>>, vector<1x128x128xbf16>
    %35 = vector.shape_cast %34 : vector<1x128x128xbf16> to vector<128x128xbf16>
    %cst_18 = arith.constant dense<0.000000e+00> : vector<64x128xf32>
    %36 = tpu.matmul %33, %35, %cst_18 {dimension_numbers = #tpu.dot_dimension_numbers<[1], [0], [0], [1], [0, 0, 1, 1], [], []>} : vector<64x128xbf16>, vector<128x128xbf16>, vector<64x128xf32> -> vector<64x128xf32>
    %c1_19 = arith.constant 1 : index
    %c0_20 = arith.constant 0 : index
    %37 = vector.load %arg3[%c1_19, %c0_20] : memref<13x128xf32, #tpu.memory_space<vmem>>, vector<1x128xf32>
    %c2 = arith.constant 2 : index
    %c0_21 = arith.constant 0 : index
    %38 = vector.load %arg3[%c2, %c0_21] : memref<13x128xf32, #tpu.memory_space<vmem>>, vector<1x128xf32>
    %cst_22 = arith.constant dense<0.000000e+00> : vector<128xf32>
    %39 = vector.multi_reduction <add>, %36, %cst_22 [0] : vector<64x128xf32> to vector<128xf32>
    %40 = vector.shape_cast %39 : vector<128xf32> to vector<1x128xf32>
    %41 = arith.mulf %36, %36 : vector<64x128xf32>
    %cst_23 = arith.constant dense<0.000000e+00> : vector<128xf32>
    %42 = vector.multi_reduction <add>, %41, %cst_23 [0] : vector<64x128xf32> to vector<128xf32>
    %43 = vector.shape_cast %42 : vector<128xf32> to vector<1x128xf32>
    %cst_24 = arith.constant 1.562500e-02 : f32
    %44 = vector.broadcast %cst_24 : f32 to vector<1x128xf32>
    %45 = arith.mulf %40, %44 : vector<1x128xf32>
    %cst_25 = arith.constant 1.562500e-02 : f32
    %46 = vector.broadcast %cst_25 : f32 to vector<1x128xf32>
    %47 = arith.mulf %43, %46 : vector<1x128xf32>
    %48 = arith.mulf %45, %45 : vector<1x128xf32>
    %49 = arith.subf %47, %48 : vector<1x128xf32>
    %cst_26 = arith.constant 0.000000e+00 : f32
    %50 = vector.broadcast %cst_26 : f32 to vector<1x128xf32>
    %51 = arith.maximumf %49, %50 : vector<1x128xf32>
    %cst_27 = arith.constant 9.99999974E-6 : f32
    %52 = vector.broadcast %cst_27 : f32 to vector<1x128xf32>
    %53 = arith.addf %51, %52 : vector<1x128xf32>
    %54 = math.rsqrt %53 : vector<1x128xf32>
    %55 = arith.mulf %37, %54 : vector<1x128xf32>
    %56 = arith.mulf %45, %55 : vector<1x128xf32>
    %57 = arith.subf %38, %56 : vector<1x128xf32>
    %58 = vector.broadcast %55 : vector<1x128xf32> to vector<64x128xf32>
    %59 = arith.mulf %36, %58 : vector<64x128xf32>
    %60 = vector.broadcast %57 : vector<1x128xf32> to vector<64x128xf32>
    %61 = arith.addf %59, %60 : vector<64x128xf32>
    %cst_28 = arith.constant 0.000000e+00 : f32
    %62 = vector.broadcast %cst_28 : f32 to vector<64x128xf32>
    %63 = arith.maximumf %61, %62 : vector<64x128xf32>
    %64 = arith.truncf %63 : vector<64x128xf32> to vector<64x128xbf16>
    %c0_29 = arith.constant 0 : index
    %c0_30 = arith.constant 0 : index
    %c0_31 = arith.constant 0 : index
    %65 = vector.load %arg6[%c0_29, %c0_30, %c0_31] : memref<3x128x128xbf16, #tpu.memory_space<vmem>>, vector<1x128x128xbf16>
    %66 = vector.shape_cast %65 : vector<1x128x128xbf16> to vector<128x128xbf16>
    %cst_32 = arith.constant dense<0.000000e+00> : vector<64x128xf32>
    %67 = tpu.matmul %64, %66, %cst_32 {dimension_numbers = #tpu.dot_dimension_numbers<[1], [0], [0], [1], [0, 0, 1, 1], [], []>} : vector<64x128xbf16>, vector<128x128xbf16>, vector<64x128xf32> -> vector<64x128xf32>
    %c3 = arith.constant 3 : index
    %c0_33 = arith.constant 0 : index
    %68 = vector.load %arg3[%c3, %c0_33] : memref<13x128xf32, #tpu.memory_space<vmem>>, vector<1x128xf32>
    %c4 = arith.constant 4 : index
    %c0_34 = arith.constant 0 : index
    %69 = vector.load %arg3[%c4, %c0_34] : memref<13x128xf32, #tpu.memory_space<vmem>>, vector<1x128xf32>
    %cst_35 = arith.constant dense<0.000000e+00> : vector<128xf32>
    %70 = vector.multi_reduction <add>, %67, %cst_35 [0] : vector<64x128xf32> to vector<128xf32>
    %71 = vector.shape_cast %70 : vector<128xf32> to vector<1x128xf32>
    %72 = arith.mulf %67, %67 : vector<64x128xf32>
    %cst_36 = arith.constant dense<0.000000e+00> : vector<128xf32>
    %73 = vector.multi_reduction <add>, %72, %cst_36 [0] : vector<64x128xf32> to vector<128xf32>
    %74 = vector.shape_cast %73 : vector<128xf32> to vector<1x128xf32>
    %cst_37 = arith.constant 1.562500e-02 : f32
    %75 = vector.broadcast %cst_37 : f32 to vector<1x128xf32>
    %76 = arith.mulf %71, %75 : vector<1x128xf32>
    %cst_38 = arith.constant 1.562500e-02 : f32
    %77 = vector.broadcast %cst_38 : f32 to vector<1x128xf32>
    %78 = arith.mulf %74, %77 : vector<1x128xf32>
    %79 = arith.mulf %76, %76 : vector<1x128xf32>
    %80 = arith.subf %78, %79 : vector<1x128xf32>
    %cst_39 = arith.constant 0.000000e+00 : f32
    %81 = vector.broadcast %cst_39 : f32 to vector<1x128xf32>
    %82 = arith.maximumf %80, %81 : vector<1x128xf32>
    %cst_40 = arith.constant 9.99999974E-6 : f32
    %83 = vector.broadcast %cst_40 : f32 to vector<1x128xf32>
    %84 = arith.addf %82, %83 : vector<1x128xf32>
    %85 = math.rsqrt %84 : vector<1x128xf32>
    %86 = arith.mulf %68, %85 : vector<1x128xf32>
    %87 = arith.mulf %76, %86 : vector<1x128xf32>
    %88 = arith.subf %69, %87 : vector<1x128xf32>
    %89 = vector.broadcast %86 : vector<1x128xf32> to vector<64x128xf32>
    %90 = arith.mulf %67, %89 : vector<64x128xf32>
    %91 = arith.addf %32, %90 : vector<64x128xf32>
    %92 = vector.broadcast %88 : vector<1x128xf32> to vector<64x128xf32>
    %93 = arith.addf %91, %92 : vector<64x128xf32>
    %94 = arith.truncf %93 : vector<64x128xf32> to vector<64x128xbf16>
    %c1_41 = arith.constant 1 : index
    %c0_42 = arith.constant 0 : index
    %c0_43 = arith.constant 0 : index
    %95 = vector.load %arg5[%c1_41, %c0_42, %c0_43] : memref<3x128x128xbf16, #tpu.memory_space<vmem>>, vector<1x128x128xbf16>
    %96 = vector.shape_cast %95 : vector<1x128x128xbf16> to vector<128x128xbf16>
    %cst_44 = arith.constant dense<0.000000e+00> : vector<64x128xf32>
    %97 = tpu.matmul %94, %96, %cst_44 {dimension_numbers = #tpu.dot_dimension_numbers<[1], [0], [0], [1], [0, 0, 1, 1], [], []>} : vector<64x128xbf16>, vector<128x128xbf16>, vector<64x128xf32> -> vector<64x128xf32>
    %c5 = arith.constant 5 : index
    %c0_45 = arith.constant 0 : index
    %98 = vector.load %arg3[%c5, %c0_45] : memref<13x128xf32, #tpu.memory_space<vmem>>, vector<1x128xf32>
    %c6 = arith.constant 6 : index
    %c0_46 = arith.constant 0 : index
    %99 = vector.load %arg3[%c6, %c0_46] : memref<13x128xf32, #tpu.memory_space<vmem>>, vector<1x128xf32>
    %cst_47 = arith.constant dense<0.000000e+00> : vector<128xf32>
    %100 = vector.multi_reduction <add>, %97, %cst_47 [0] : vector<64x128xf32> to vector<128xf32>
    %101 = vector.shape_cast %100 : vector<128xf32> to vector<1x128xf32>
    %102 = arith.mulf %97, %97 : vector<64x128xf32>
    %cst_48 = arith.constant dense<0.000000e+00> : vector<128xf32>
    %103 = vector.multi_reduction <add>, %102, %cst_48 [0] : vector<64x128xf32> to vector<128xf32>
    %104 = vector.shape_cast %103 : vector<128xf32> to vector<1x128xf32>
    %cst_49 = arith.constant 1.562500e-02 : f32
    %105 = vector.broadcast %cst_49 : f32 to vector<1x128xf32>
    %106 = arith.mulf %101, %105 : vector<1x128xf32>
    %cst_50 = arith.constant 1.562500e-02 : f32
    %107 = vector.broadcast %cst_50 : f32 to vector<1x128xf32>
    %108 = arith.mulf %104, %107 : vector<1x128xf32>
    %109 = arith.mulf %106, %106 : vector<1x128xf32>
    %110 = arith.subf %108, %109 : vector<1x128xf32>
    %cst_51 = arith.constant 0.000000e+00 : f32
    %111 = vector.broadcast %cst_51 : f32 to vector<1x128xf32>
    %112 = arith.maximumf %110, %111 : vector<1x128xf32>
    %cst_52 = arith.constant 9.99999974E-6 : f32
    %113 = vector.broadcast %cst_52 : f32 to vector<1x128xf32>
    %114 = arith.addf %112, %113 : vector<1x128xf32>
    %115 = math.rsqrt %114 : vector<1x128xf32>
    %116 = arith.mulf %98, %115 : vector<1x128xf32>
    %117 = arith.mulf %106, %116 : vector<1x128xf32>
    %118 = arith.subf %99, %117 : vector<1x128xf32>
    %119 = vector.broadcast %116 : vector<1x128xf32> to vector<64x128xf32>
    %120 = arith.mulf %97, %119 : vector<64x128xf32>
    %121 = vector.broadcast %118 : vector<1x128xf32> to vector<64x128xf32>
    %122 = arith.addf %120, %121 : vector<64x128xf32>
    %cst_53 = arith.constant 0.000000e+00 : f32
    %123 = vector.broadcast %cst_53 : f32 to vector<64x128xf32>
    %124 = arith.maximumf %122, %123 : vector<64x128xf32>
    %125 = arith.truncf %124 : vector<64x128xf32> to vector<64x128xbf16>
    %c1_54 = arith.constant 1 : index
    %c0_55 = arith.constant 0 : index
    %c0_56 = arith.constant 0 : index
    %126 = vector.load %arg6[%c1_54, %c0_55, %c0_56] : memref<3x128x128xbf16, #tpu.memory_space<vmem>>, vector<1x128x128xbf16>
    %127 = vector.shape_cast %126 : vector<1x128x128xbf16> to vector<128x128xbf16>
    %cst_57 = arith.constant dense<0.000000e+00> : vector<64x128xf32>
    %128 = tpu.matmul %125, %127, %cst_57 {dimension_numbers = #tpu.dot_dimension_numbers<[1], [0], [0], [1], [0, 0, 1, 1], [], []>} : vector<64x128xbf16>, vector<128x128xbf16>, vector<64x128xf32> -> vector<64x128xf32>
    %c7 = arith.constant 7 : index
    %c0_58 = arith.constant 0 : index
    %129 = vector.load %arg3[%c7, %c0_58] : memref<13x128xf32, #tpu.memory_space<vmem>>, vector<1x128xf32>
    %c8 = arith.constant 8 : index
    %c0_59 = arith.constant 0 : index
    %130 = vector.load %arg3[%c8, %c0_59] : memref<13x128xf32, #tpu.memory_space<vmem>>, vector<1x128xf32>
    %cst_60 = arith.constant dense<0.000000e+00> : vector<128xf32>
    %131 = vector.multi_reduction <add>, %128, %cst_60 [0] : vector<64x128xf32> to vector<128xf32>
    %132 = vector.shape_cast %131 : vector<128xf32> to vector<1x128xf32>
    %133 = arith.mulf %128, %128 : vector<64x128xf32>
    %cst_61 = arith.constant dense<0.000000e+00> : vector<128xf32>
    %134 = vector.multi_reduction <add>, %133, %cst_61 [0] : vector<64x128xf32> to vector<128xf32>
    %135 = vector.shape_cast %134 : vector<128xf32> to vector<1x128xf32>
    %cst_62 = arith.constant 1.562500e-02 : f32
    %136 = vector.broadcast %cst_62 : f32 to vector<1x128xf32>
    %137 = arith.mulf %132, %136 : vector<1x128xf32>
    %cst_63 = arith.constant 1.562500e-02 : f32
    %138 = vector.broadcast %cst_63 : f32 to vector<1x128xf32>
    %139 = arith.mulf %135, %138 : vector<1x128xf32>
    %140 = arith.mulf %137, %137 : vector<1x128xf32>
    %141 = arith.subf %139, %140 : vector<1x128xf32>
    %cst_64 = arith.constant 0.000000e+00 : f32
    %142 = vector.broadcast %cst_64 : f32 to vector<1x128xf32>
    %143 = arith.maximumf %141, %142 : vector<1x128xf32>
    %cst_65 = arith.constant 9.99999974E-6 : f32
    %144 = vector.broadcast %cst_65 : f32 to vector<1x128xf32>
    %145 = arith.addf %143, %144 : vector<1x128xf32>
    %146 = math.rsqrt %145 : vector<1x128xf32>
    %147 = arith.mulf %129, %146 : vector<1x128xf32>
    %148 = arith.mulf %137, %147 : vector<1x128xf32>
    %149 = arith.subf %130, %148 : vector<1x128xf32>
    %150 = vector.broadcast %147 : vector<1x128xf32> to vector<64x128xf32>
    %151 = arith.mulf %128, %150 : vector<64x128xf32>
    %152 = arith.addf %93, %151 : vector<64x128xf32>
    %153 = vector.broadcast %149 : vector<1x128xf32> to vector<64x128xf32>
    %154 = arith.addf %152, %153 : vector<64x128xf32>
    %155 = arith.truncf %154 : vector<64x128xf32> to vector<64x128xbf16>
    %c2_66 = arith.constant 2 : index
    %c0_67 = arith.constant 0 : index
    %c0_68 = arith.constant 0 : index
    %156 = vector.load %arg5[%c2_66, %c0_67, %c0_68] : memref<3x128x128xbf16, #tpu.memory_space<vmem>>, vector<1x128x128xbf16>
    %157 = vector.shape_cast %156 : vector<1x128x128xbf16> to vector<128x128xbf16>
    %cst_69 = arith.constant dense<0.000000e+00> : vector<64x128xf32>
    %158 = tpu.matmul %155, %157, %cst_69 {dimension_numbers = #tpu.dot_dimension_numbers<[1], [0], [0], [1], [0, 0, 1, 1], [], []>} : vector<64x128xbf16>, vector<128x128xbf16>, vector<64x128xf32> -> vector<64x128xf32>
    %c9 = arith.constant 9 : index
    %c0_70 = arith.constant 0 : index
    %159 = vector.load %arg3[%c9, %c0_70] : memref<13x128xf32, #tpu.memory_space<vmem>>, vector<1x128xf32>
    %c10 = arith.constant 10 : index
    %c0_71 = arith.constant 0 : index
    %160 = vector.load %arg3[%c10, %c0_71] : memref<13x128xf32, #tpu.memory_space<vmem>>, vector<1x128xf32>
    %cst_72 = arith.constant dense<0.000000e+00> : vector<128xf32>
    %161 = vector.multi_reduction <add>, %158, %cst_72 [0] : vector<64x128xf32> to vector<128xf32>
    %162 = vector.shape_cast %161 : vector<128xf32> to vector<1x128xf32>
    %163 = arith.mulf %158, %158 : vector<64x128xf32>
    %cst_73 = arith.constant dense<0.000000e+00> : vector<128xf32>
    %164 = vector.multi_reduction <add>, %163, %cst_73 [0] : vector<64x128xf32> to vector<128xf32>
    %165 = vector.shape_cast %164 : vector<128xf32> to vector<1x128xf32>
    %cst_74 = arith.constant 1.562500e-02 : f32
    %166 = vector.broadcast %cst_74 : f32 to vector<1x128xf32>
    %167 = arith.mulf %162, %166 : vector<1x128xf32>
    %cst_75 = arith.constant 1.562500e-02 : f32
    %168 = vector.broadcast %cst_75 : f32 to vector<1x128xf32>
    %169 = arith.mulf %165, %168 : vector<1x128xf32>
    %170 = arith.mulf %167, %167 : vector<1x128xf32>
    %171 = arith.subf %169, %170 : vector<1x128xf32>
    %cst_76 = arith.constant 0.000000e+00 : f32
    %172 = vector.broadcast %cst_76 : f32 to vector<1x128xf32>
    %173 = arith.maximumf %171, %172 : vector<1x128xf32>
    %cst_77 = arith.constant 9.99999974E-6 : f32
    %174 = vector.broadcast %cst_77 : f32 to vector<1x128xf32>
    %175 = arith.addf %173, %174 : vector<1x128xf32>
    %176 = math.rsqrt %175 : vector<1x128xf32>
    %177 = arith.mulf %159, %176 : vector<1x128xf32>
    %178 = arith.mulf %167, %177 : vector<1x128xf32>
    %179 = arith.subf %160, %178 : vector<1x128xf32>
    %180 = vector.broadcast %177 : vector<1x128xf32> to vector<64x128xf32>
    %181 = arith.mulf %158, %180 : vector<64x128xf32>
    %182 = vector.broadcast %179 : vector<1x128xf32> to vector<64x128xf32>
    %183 = arith.addf %181, %182 : vector<64x128xf32>
    %cst_78 = arith.constant 0.000000e+00 : f32
    %184 = vector.broadcast %cst_78 : f32 to vector<64x128xf32>
    %185 = arith.maximumf %183, %184 : vector<64x128xf32>
    %186 = arith.truncf %185 : vector<64x128xf32> to vector<64x128xbf16>
    %c2_79 = arith.constant 2 : index
    %c0_80 = arith.constant 0 : index
    %c0_81 = arith.constant 0 : index
    %187 = vector.load %arg6[%c2_79, %c0_80, %c0_81] : memref<3x128x128xbf16, #tpu.memory_space<vmem>>, vector<1x128x128xbf16>
    %188 = vector.shape_cast %187 : vector<1x128x128xbf16> to vector<128x128xbf16>
    %cst_82 = arith.constant dense<0.000000e+00> : vector<64x128xf32>
    %189 = tpu.matmul %186, %188, %cst_82 {dimension_numbers = #tpu.dot_dimension_numbers<[1], [0], [0], [1], [0, 0, 1, 1], [], []>} : vector<64x128xbf16>, vector<128x128xbf16>, vector<64x128xf32> -> vector<64x128xf32>
    %c11 = arith.constant 11 : index
    %c0_83 = arith.constant 0 : index
    %190 = vector.load %arg3[%c11, %c0_83] : memref<13x128xf32, #tpu.memory_space<vmem>>, vector<1x128xf32>
    %c12 = arith.constant 12 : index
    %c0_84 = arith.constant 0 : index
    %191 = vector.load %arg3[%c12, %c0_84] : memref<13x128xf32, #tpu.memory_space<vmem>>, vector<1x128xf32>
    %cst_85 = arith.constant dense<0.000000e+00> : vector<128xf32>
    %192 = vector.multi_reduction <add>, %189, %cst_85 [0] : vector<64x128xf32> to vector<128xf32>
    %193 = vector.shape_cast %192 : vector<128xf32> to vector<1x128xf32>
    %194 = arith.mulf %189, %189 : vector<64x128xf32>
    %cst_86 = arith.constant dense<0.000000e+00> : vector<128xf32>
    %195 = vector.multi_reduction <add>, %194, %cst_86 [0] : vector<64x128xf32> to vector<128xf32>
    %196 = vector.shape_cast %195 : vector<128xf32> to vector<1x128xf32>
    %cst_87 = arith.constant 1.562500e-02 : f32
    %197 = vector.broadcast %cst_87 : f32 to vector<1x128xf32>
    %198 = arith.mulf %193, %197 : vector<1x128xf32>
    %cst_88 = arith.constant 1.562500e-02 : f32
    %199 = vector.broadcast %cst_88 : f32 to vector<1x128xf32>
    %200 = arith.mulf %196, %199 : vector<1x128xf32>
    %201 = arith.mulf %198, %198 : vector<1x128xf32>
    %202 = arith.subf %200, %201 : vector<1x128xf32>
    %cst_89 = arith.constant 0.000000e+00 : f32
    %203 = vector.broadcast %cst_89 : f32 to vector<1x128xf32>
    %204 = arith.maximumf %202, %203 : vector<1x128xf32>
    %cst_90 = arith.constant 9.99999974E-6 : f32
    %205 = vector.broadcast %cst_90 : f32 to vector<1x128xf32>
    %206 = arith.addf %204, %205 : vector<1x128xf32>
    %207 = math.rsqrt %206 : vector<1x128xf32>
    %208 = arith.mulf %190, %207 : vector<1x128xf32>
    %209 = arith.mulf %198, %208 : vector<1x128xf32>
    %210 = arith.subf %191, %209 : vector<1x128xf32>
    %211 = vector.broadcast %208 : vector<1x128xf32> to vector<64x128xf32>
    %212 = arith.mulf %189, %211 : vector<64x128xf32>
    %213 = arith.addf %154, %212 : vector<64x128xf32>
    %214 = vector.broadcast %210 : vector<1x128xf32> to vector<64x128xf32>
    %215 = arith.addf %213, %214 : vector<64x128xf32>
    %c0_91 = arith.constant 0 : index
    %c0_92 = arith.constant 0 : index
    %c0_93 = arith.constant 0 : index
    %216 = vector.load %arg7[%c0_91, %c0_92, %c0_93] : memref<1x64x128xf32, #tpu.memory_space<vmem>>, vector<1x64x128xf32>
    %217 = vector.shape_cast %216 : vector<1x64x128xf32> to vector<64x128xf32>
    %218 = vector.shape_cast %215 : vector<64x128xf32> to vector<1x64x128xf32>
    tpu.vector_store %arg7[%c0_91, %c0_92, %c0_93], %218 {strides = array<i32>} : memref<1x64x128xf32, #tpu.memory_space<vmem>>, vector<1x64x128xf32>,
    return
  }
  func.func @transform_0(%arg0: i32) -> (i32, i32, i32) {
    %c0_i32 = arith.constant 0 : i32
    %c0_i32_0 = arith.constant 0 : i32
    %c0_i32_1 = arith.constant 0 : i32
    return %arg0, %c0_i32, %c0_i32_0 : i32, i32, i32
  }
  func.func @transform_1(%arg0: i32) -> (i32, i32) {
    %c0_i32 = arith.constant 0 : i32
    %c0_i32_0 = arith.constant 0 : i32
    %c0_i32_1 = arith.constant 0 : i32
    return %c0_i32, %c0_i32_0 : i32, i32
  }
  func.func @transform_2(%arg0: i32) -> (i32, i32) {
    %c0_i32 = arith.constant 0 : i32
    %c0_i32_0 = arith.constant 0 : i32
    %c0_i32_1 = arith.constant 0 : i32
    return %c0_i32, %c0_i32_0 : i32, i32
  }
  func.func @transform_3(%arg0: i32) -> (i32, i32) {
    %c0_i32 = arith.constant 0 : i32
    %c0_i32_0 = arith.constant 0 : i32
    %c0_i32_1 = arith.constant 0 : i32
    return %c0_i32, %c0_i32_0 : i32, i32
  }
  func.func @transform_4(%arg0: i32) -> (i32, i32, i32) {
    %c0_i32 = arith.constant 0 : i32
    %c0_i32_0 = arith.constant 0 : i32
    %c0_i32_1 = arith.constant 0 : i32
    %c0_i32_2 = arith.constant 0 : i32
    return %c0_i32, %c0_i32_0, %c0_i32_1 : i32, i32, i32
  }
  func.func @transform_5(%arg0: i32) -> (i32, i32, i32) {
    %c0_i32 = arith.constant 0 : i32
    %c0_i32_0 = arith.constant 0 : i32
    %c0_i32_1 = arith.constant 0 : i32
    %c0_i32_2 = arith.constant 0 : i32
    return %c0_i32, %c0_i32_0, %c0_i32_1 : i32, i32, i32
  }
  func.func @transform_6(%arg0: i32) -> (i32, i32, i32) {
    %c0_i32 = arith.constant 0 : i32
    %c0_i32_0 = arith.constant 0 : i32
    %c0_i32_1 = arith.constant 0 : i32
    return %arg0, %c0_i32, %c0_i32_0 : i32, i32, i32
  }
}

</mosaic_0001>

<bundles_post_ra>
// kernel: mlp_decoder_forward.1
= control target key start
LH: loop header
LB: loop body
LE: loop exit
PB: predicated region body
PF: predicated region fallthrough
CT: control target
= control target key end

     0   :  { %11 = vsyncpa [#allocation3], 0  ;;  %s2276_s0 = inlined_call_operand.vmem [shape: f32[1,64,32], index: 0, kind: input, shape index: {}]   ;;  %s2277_s1 = inlined_call_operand.vmem [shape: f32[2,32], index: 1, kind: input, shape index: {}]   ;;  %s2278_s2 = inlined_call_operand.vmem [shape: f32[13,128], index: 2, kind: input, shape index: {}]   ;;  %s2279_s3 = inlined_call_operand.vmem [shape: bf16[32,128], index: 3, kind: input, shape index: {}]   ;;  %s2280_s4 = inlined_call_operand.hbm [shape: bf16[3,128,128], index: 4, kind: input, shape index: {}]   ;;  %s2281_s5 = inlined_call_operand.hbm [shape: bf16[3,128,128], index: 5, kind: input, shape index: {}]   ;;  %s2282_s6 = inlined_call_operand.vmem [shape: f32[1,64,128], index: 6, kind: output, shape index: {}]  }
   0x1   :  { %12 = vsyncpa [#allocation5], 0  ;;  %s1934_s21 = smov [#allocation2]  }
   0x2   :  { %s26_s22 = sshll.u32 %s1934_s21, 4  ;;  %s27_s22 = int_to_ptr.vmem [resolvable:$true] %s26_s22 }
   0x3   :  { %s1898_s23 = scalar_lea.vmem %s27_s22, 3072  ;;  %p1903_p1 = scmp.lt.s32.totalorder %s27_s22, %s27_s22 }
   0x4   :  { %p1899_p0 = scmp.ne.s32.totalorder %s27_s22, %s1898_s23  ;;  %p1904_p2 = scmp.lt.s32.totalorder %s1898_s23, %s1898_s23 }
   0x6   :  { %p1905_p3 = por %p1904_p2, %p1903_p1 }
   0x8   :  { %p1906_p4 = pnand %p1905_p3, %p1899_p0 }
   0xa   :  { %1909 = shalt.err (!%p1906_p4)
}
   0xb   :  { %s1935_s24 = smov 64   ;;  %s1936_s25 = smov 4  }
   0xc   :  { %32 = dma.hbm_to_vmem [thread:$0]  %s2280_s4, 3072, %s27_s22, [#allocation3], %s1935_s24, %s1935_s24, %s1936_s25  }
   0xd   :  { %s1937_s28 = smov [#allocation4]  }
   0xe   :  { %s38_s29 = sshll.u32 %s1937_s28, 4  ;;  %s39_s29 = int_to_ptr.vmem [resolvable:$true] %s38_s29 }
   0xf   :  { %s1918_s30 = scalar_lea.vmem %s39_s29, 3072  ;;  %p1923_p6 = scmp.lt.s32.totalorder %s39_s29, %s39_s29 }
  0x10   :  { %p1919_p5 = scmp.ne.s32.totalorder %s39_s29, %s1918_s30  ;;  %p1924_p7 = scmp.lt.s32.totalorder %s1918_s30, %s1918_s30 }
  0x12   :  { %p1925_p8 = por %p1924_p7, %p1923_p6 }
  0x14   :  { %p1926_p9 = pnand %p1925_p8, %p1919_p5 }
  0x16   :  { %1929 = shalt.err (!%p1926_p9)
}
  0x17   :  { %44 = dma.hbm_to_vmem [thread:$0]  %s2281_s5, 3072, %s39_s29, [#allocation5], %s1935_s24, %s1935_s24, %s1936_s25  }
  0x18   :  { %1930 = dma.done.wait [#allocation3], 3072  }
  0x19   :  { %1931 = vsyncadd [#allocation3], 4294964224 }
  0x1a   :  { %1932 = dma.done.wait [#allocation5], 3072  }
  0x1b   :  { %1933 = vsyncadd [#allocation5], 4294964224  ;;  %v1826_v0 = vld [vmem:[%s2279_s3 + $0x8] sm:$0xff]   ;;  %vm62_vm0 = vcmask 261120   ;;  %v1827_v1 = vld [vmem:[%s2279_s3] sm:$0xff]  }
  0x1c   :  { %1666 = vmatprep.subr.bf16.mxu0 %v1826_v0  ;;  %v1988_v2 = vld [vmem:[%s2276_s0] sm:$0xff]  ;;  %v1993_v3 = vld [vmem:[%s2276_s0 + $0x8] sm:$0xff]  ;;  %v1998_v4 = vld [vmem:[%s2276_s0 + $0x10] sm:$0xff] }
  0x1d   :  { %1667 = vmatpush3.bf16.msra.mxu0 %v1826_v0  ;;  %v2003_v5 = vld [vmem:[%s2276_s0 + $0x18] sm:$0xff]  ;;  %v2008_v6 = vld [vmem:[%s2276_s0 + $0x20] sm:$0xff]  ;;  %v2013_v7 = vld [vmem:[%s2276_s0 + $0x28] sm:$0xff]  ;;  %v63_v8 = vsel %vm62_vm0, %v1988_v2, 0.0  ;;  %v64_v9 = vsel %vm62_vm0, %v1993_v3, 0.0  ;;  %v66_v10 = vsel %vm62_vm0, %v1998_v4, 0.0  ;;  %v84_v11 = vmul.f32 %v1988_v2, %v1988_v2 }
  0x1e   :  { %1668 = vmatprep.subr.bf16.mxu0 %v1827_v1  ;;  %v2026_v12 = vld [vmem:[%s2276_s0 + $0x30] sm:$0xff]  ;;  %v2031_v13 = vld [vmem:[%s2276_s0 + $0x38] sm:$0xff]  ;;  %v65_v14 = vadd.f32 %v64_v9, %v63_v8  ;;  %v85_v15 = vmul.f32 %v1993_v3, %v1993_v3  ;;  %v68_v16 = vsel %vm62_vm0, %v2003_v5, 0.0  ;;  %v70_v17 = vsel %vm62_vm0, %v2008_v6, 0.0  ;;  %v1830_v37 = vld [vmem:[#allocation2 + $0x28] sm:$0xff]  }
  0x1f   :  { %v72_v18 = vsel %vm62_vm0, %v2013_v7, 0.0  ;;  %v86_v19 = vmul.f32 %v1998_v4, %v1998_v4  ;;  %v1828_v20 = vld [vmem:[#allocation2 + $0x38] sm:$0xff]   ;;  %v87_v22 = vmul.f32 %v2003_v5, %v2003_v5  ;;  %v88_v23 = vmul.f32 %v2008_v6, %v2008_v6  ;;  %v1829_v29 = vld [vmem:[#allocation2 + $0x30] sm:$0xff]   ;;  %v1831_v43 = vld [vmem:[#allocation2 + $0x20] sm:$0xff]  }
  0x20   :  { %v67_v21 = vadd.f32 %v66_v10, %v65_v14  ;;  %v89_v24 = vmul.f32 %v2013_v7, %v2013_v7  ;;  %v90_v25 = vmul.f32 %v2026_v12, %v2026_v12  ;;  %v91_v26 = vmul.f32 %v2031_v13, %v2031_v13  ;;  %1678 = vmatprep.subr.bf16.mxu1 %v1828_v20  ;;  %v1832_v48 = vld [vmem:[#allocation2 + $0x18] sm:$0xff]  }
  0x21   :  { %1669 = vmatpush3.bf16.msra.mxu0 %v1827_v1  ;;  %v92_v27 = vsel %vm62_vm0, %v84_v11, 0.0  ;;  %v93_v28 = vsel %vm62_vm0, %v85_v15, 0.0  ;;  %v74_v31 = vsel %vm62_vm0, %v2026_v12, 0.0  ;;  %v95_v33 = vsel %vm62_vm0, %v86_v19, 0.0  ;;  %1679 = vmatpush3.bf16.msra.mxu1 %v1828_v20 }
  0x22   :  { %v69_v30 = vadd.f32 %v68_v16, %v67_v21  ;;  %v94_v32 = vadd.f32 %v93_v28, %v92_v27  ;;  %v76_v34 = vsel %vm62_vm0, %v2031_v13, 0.0  ;;  %v97_v35 = vsel %vm62_vm0, %v87_v22, 0.0  ;;  %1680 = vmatprep.subr.bf16.mxu1 %v1829_v29  ;;  %v61_v21 = vld [vmem:[%s2277_s1 + $0x1] sm:$0x1] }
  0x23   :  { %v99_v36 = vsel %vm62_vm0, %v88_v23, 0.0  ;;  %v101_v40 = vsel %vm62_vm0, %v89_v24, 0.0  ;;  %v103_v41 = vsel %vm62_vm0, %v90_v25, 0.0  ;;  %v105_v42 = vsel %vm62_vm0, %v91_v26, 0.0 }
  0x24   :  { %v71_v38 = vadd.f32 %v70_v17, %v69_v30  ;;  %v96_v39 = vadd.f32 %v95_v33, %v94_v32  ;;  %v123_v15 = vlaneseq  ;;  %v60_v17 = vld [vmem:[%s2277_s1] sm:$0x1] }
  0x25   :  { %1681 = vmatpush3.bf16.msra.mxu1 %v1829_v29 }
  0x26   :  { %v73_v44 = vadd.f32 %v72_v18, %v71_v38  ;;  %v98_v45 = vadd.f32 %v97_v35, %v96_v39  ;;  %1682 = vmatprep.subr.bf16.mxu1 %v1830_v37  ;;  %v124_v16 = vshrl.u32 %v123_v15, 7 }
  0x28   :  { %v75_v46 = vadd.f32 %v74_v31, %v73_v44  ;;  %v100_v47 = vadd.f32 %v99_v36, %v98_v45  ;;  %v2068_v18 = vsub.s32 0, %v124_v16  ;;  %v1533_v44 = vld [vmem:[%s2278_s2] ss:$0 sm:$0xff] }
  0x29   :  { %1683 = vmatpush3.bf16.msra.mxu1 %v1830_v37 }
  0x2a   :  { %v77_v49 = vadd.f32 %v76_v34, %v75_v46  ;;  %v102_v50 = vadd.f32 %v101_v40, %v100_v47  ;;  %1684 = vmatprep.subr.bf16.mxu1 %v1831_v43  ;;  %v1833_v40 = vld [vmem:[#allocation2 + $0x10] sm:$0xff]  }
  0x2c   :  { %v78_v51 = vrot.slane %v77_v49, 4  ;;  %v104_v52 = vadd.f32 %v103_v41, %v102_v50 }
  0x2d   :  { %1685 = vmatpush3.bf16.msra.mxu1 %v1831_v43 }
  0x2e   :  { %v79_v53 = vadd.f32 %v78_v51, %v77_v49  ;;  %v106_v54 = vadd.f32 %v105_v42, %v104_v52  ;;  %1686 = vmatprep.subr.bf16.mxu1 %v1832_v48 }
  0x30   :  { %v80_v55 = vrot.slane %v79_v53, 2  ;;  %v107_v56 = vrot.slane %v106_v54, 4 }
  0x31   :  { %1687 = vmatpush3.bf16.msra.mxu1 %v1832_v48 }
  0x32   :  { %v81_v57 = vadd.f32 %v80_v55, %v79_v53  ;;  %v108_v58 = vadd.f32 %v107_v56, %v106_v54  ;;  %1688 = vmatprep.subr.bf16.mxu1 %v1833_v40 }
  0x34   :  { %v82_v59 = vrot.slane %v81_v57, 1  ;;  %v109_v60 = vrot.slane %v108_v58, 2 }
  0x35   :  { %1689 = vmatpush3.bf16.msra.mxu1 %v1833_v40 }
  0x36   :  { %v83_v61 = vadd.f32 %v82_v59, %v81_v57  ;;  %v110_v62 = vadd.f32 %v109_v60, %v108_v58 }
  0x38   :  { %v111_v63 = vrot.slane %v110_v62, 1  ;;  %v113_v0 = vmul.f32 0.015625, %v83_v61 }
  0x3a   :  { %v112_v1 = vadd.f32 %v111_v63, %v110_v62  ;;  %v115_v8 = vmul.f32 %v113_v0, %v113_v0  ;;  %v1836_v62 = vld [vmem:[#allocation4 + $0x38] sm:$0xff]   ;;  %v1837_v63 = vld [vmem:[#allocation4 + $0x30] sm:$0xff]  }
  0x3b   :  { %1702 = vmatprep.subr.bf16.mxu0 %v1836_v62 }
  0x3c   :  { %v114_v9 = vmul.f32 0.015625, %v112_v1  ;;  %v1839_v1 = vld [vmem:[#allocation4 + $0x20] sm:$0xff]  }
  0x3e   :  { %v116_v10 = vsub.f32 %v114_v9, %v115_v8  ;;  %v1840_v8 = vld [vmem:[#allocation4 + $0x18] sm:$0xff]   ;;  %v1841_v9 = vld [vmem:[#allocation4 + $0x10] sm:$0xff]  }
  0x40   :  { %v117_v11 = vmax.f32 %v116_v10, 0.0  ;;  %v1842_v10 = vld [vmem:[#allocation4 + $0x8] sm:$0xff]  }
  0x42   :  { %v118_v14 = vadd.f32 1e-05, %v117_v11  ;;  %v1843_v11 = vld [vmem:[#allocation4] sm:$0xff]  }
  0x44   :  { %1876 = vrsqrt.f32 %v118_v14 }
  0x51   :  { %v1877_v19 = vpop.eup %1876 }
  0x52   :  { %v120_v20 = vmul.f32 %v1877_v19, %v60_v17 }
  0x54   :  { %v121_v22 = vmul.f32 %v120_v20, %v113_v0  ;;  %v126_v23 = vrot.slane %v120_v20, %v2068_v18  ;;  %v1838_v0 = vld [vmem:[#allocation4 + $0x28] sm:$0xff]  }
  0x56   :  { %v122_v24 = vsub.f32 %v61_v21, %v121_v22  ;;  %v127_v25 = vmul.f32 %v126_v23, %v1988_v2  ;;  %v128_v26 = vmul.f32 %v126_v23, %v1993_v3  ;;  %v129_v27 = vmul.f32 %v126_v23, %v1998_v4 }
  0x57   :  { %v130_v28 = vmul.f32 %v126_v23, %v2003_v5  ;;  %v131_v29 = vmul.f32 %v126_v23, %v2008_v6  ;;  %v132_v30 = vmul.f32 %v126_v23, %v2013_v7  ;;  %v133_v2 = vmul.f32 %v126_v23, %v2026_v12  ;;  %v1834_v12 = vld [vmem:[#allocation2 + $0x8] sm:$0xff]  }
  0x58   :  { %v138_v31 = vrot.slane %v122_v24, %v2068_v18  ;;  %v134_v3 = vmul.f32 %v126_v23, %v2031_v13  ;;  %1690 = vmatprep.subr.bf16.mxu1 %v1834_v12  ;;  %v1835_v13 = vld [vmem:[#allocation2] sm:$0xff]  }
  0x59   :  { %1691 = vmatpush3.bf16.msra.mxu1 %v1834_v12 }
  0x5a   :  { %v139_v32 = vadd.f32 %v138_v31, %v127_v25  ;;  %v140_v33 = vadd.f32 %v138_v31, %v128_v26  ;;  %v141_v34 = vadd.f32 %v138_v31, %v129_v27  ;;  %v142_v35 = vadd.f32 %v138_v31, %v130_v28  ;;  %1692 = vmatprep.subr.bf16.mxu1 %v1835_v13 }
  0x5b   :  { %v143_v36 = vadd.f32 %v138_v31, %v131_v29  ;;  %v144_v37 = vadd.f32 %v138_v31, %v132_v30  ;;  %v145_v5 = vadd.f32 %v138_v31, %v133_v2  ;;  %v146_v6 = vadd.f32 %v138_v31, %v134_v3 }
  0x5c   :  { %v147_v38 = vpack.c.bf16 %v140_v33, %v139_v32  ;;  %v148_v4 = vpack.c.bf16 %v142_v35, %v141_v34 }
  0x5d   :  { %v149_v39 = vpack.c.bf16 %v144_v37, %v143_v36  ;;  %v150_v7 = vpack.c.bf16 %v146_v6, %v145_v5  ;;  %1693 = vmatpush3.bf16.msra.mxu1 %v1835_v13 }
  0x5e   :  { %1670 = vmatprep.mubr.msk.bf16.mxu0 %vm62_vm0, %v147_v38 }
  0x5f   :  { %1671 = vmatmul.mubr.msk.bf16.vlgmr.msra.gmra.mxu0 %vm62_vm0, %v148_v4 }
  0x60   :  { %1674 = vmatprep.mubr.msk.bf16.mxu0 %vm62_vm0, %v149_v39  ;;  %1703 = vmatpush3.bf16.msra.mxu0 %v1836_v62 }
  0x61   :  { %1704 = vmatprep.subr.bf16.mxu0 %v1837_v63 }
  0x64   :  { %1705 = vmatpush3.bf16.msra.mxu0 %v1837_v63  ;;  %v382_v63 = vld [vmem:[%s2278_s2 + $0x1] sm:$0x1] }
  0x65   :  { %1706 = vmatprep.subr.bf16.mxu0 %v1838_v0 }
  0x67   :  { %1675 = vmatmul.mubr.msk.bf16.gmra.mxu0 %vm62_vm0, %v150_v7 }
  0x68   :  { %1707 = vmatpush3.bf16.msra.mxu0 %v1838_v0 }
  0x69   :  { %1708 = vmatprep.subr.bf16.mxu0 %v1839_v1 }
  0x6c   :  { %1709 = vmatpush3.bf16.msra.mxu0 %v1839_v1 }
  0x6d   :  { %1710 = vmatprep.subr.bf16.mxu0 %v1840_v8 }
  0x70   :  { %1711 = vmatpush3.bf16.msra.mxu0 %v1840_v8  ;;  %v383_v8 = vld [vmem:[%s2278_s2 + $0x2] sm:$0x1] }
  0x71   :  { %1712 = vmatprep.subr.bf16.mxu0 %v1841_v9 }
  0x74   :  { %1713 = vmatpush3.bf16.msra.mxu0 %v1841_v9 }
  0x75   :  { %1714 = vmatprep.subr.bf16.mxu0 %v1842_v10 }
  0x78   :  { %1715 = vmatpush3.bf16.msra.mxu0 %v1842_v10 }
  0x79   :  { %1716 = vmatprep.subr.bf16.mxu0 %v1843_v11 }
  0x7c   :  { %1717 = vmatpush3.bf16.msra.mxu0 %v1843_v11 }
 0x11f   :  { %v1672_v41 = vpop.f32.mrf.mxu0 }
 0x120   :  { %v2096_v49 = vadd.f32 %v1672_v41, %v1533_v44 }
 0x121   :  { %v218_v42 = vpop.f32.mrf.mxu0 }
 0x122   :  { %v2092_v47 = vadd.f32 %v1533_v44, %v218_v42 }
 0x123   :  { %v1673_v43 = vpop.f32.mrf.mxu0 }
 0x124   :  { %v2090_v45 = vadd.f32 %v1673_v43, %v1533_v44 }
 0x125   :  { %v221_v46 = vpop.f32.mrf.mxu0 }
 0x126   :  { %v2094_v48 = vadd.f32 %v1533_v44, %v221_v46  ;;  %v250_v52 = vpack.c.bf16 %v2090_v45, %v2096_v49 }
 0x127   :  { %v1676_v50 = vpop.f32.mrf.mxu0 }
 0x128   :  { %v249_v51 = vpack.c.bf16 %v2094_v48, %v2092_v47  ;;  %v2108_v59 = vadd.f32 %v1676_v50, %v1533_v44 }
 0x129   :  { %v234_v53 = vpop.f32.mrf.mxu0 }
 0x12a   :  { %1694 = vmatprep.mubr.bf16.mxu1 %v249_v51  ;;  %v2104_v57 = vadd.f32 %v1533_v44, %v234_v53 }
 0x12b   :  { %v1677_v54 = vpop.f32.mrf.mxu0  ;;  %1695 = vmatmul.mubr.bf16.vlgmr.msra.gmra.mxu1 %v250_v52 }
 0x12c   :  { %v2102_v55 = vadd.f32 %v1677_v54, %v1533_v44 }
 0x12d   :  { %v237_v56 = vpop.f32.mrf.mxu0 }
 0x12e   :  { %v2106_v58 = vadd.f32 %v1533_v44, %v237_v56  ;;  %v252_v61 = vpack.c.bf16 %v2102_v55, %v2108_v59 }
 0x130   :  { %v251_v60 = vpack.c.bf16 %v2106_v58, %v2104_v57 }
 0x132   :  { %1698 = vmatprep.mubr.bf16.mxu1 %v251_v60 }
 0x133   :  { %1699 = vmatmul.mubr.bf16.gmra.mxu1 %v252_v61 }
 0x1eb   :  { %v1696_v14 = vpop.f32.mrf.mxu1 }
 0x1ec   :  { %v399_v23 = vmul.f32 %v1696_v14, %v1696_v14 }
 0x1ed   :  { %v351_v15 = vpop.f32.mrf.mxu1 }
 0x1ee   :  { %v397_v19 = vmul.f32 %v351_v15, %v351_v15 }
 0x1ef   :  { %v1697_v16 = vpop.f32.mrf.mxu1 }
 0x1f0   :  { %v400_v27 = vmul.f32 %v1697_v16, %v1697_v16 }
 0x1f1   :  { %v354_v17 = vpop.f32.mrf.mxu1 }
 0x1f2   :  { %v384_v20 = vadd.f32 %v354_v17, %v351_v15  ;;  %v398_v21 = vmul.f32 %v354_v17, %v354_v17 }
 0x1f3   :  { %v2114_v22 = vpop.f32.mrf.mxu1 }
 0x1f4   :  { %v385_v24 = vadd.f32 %v1696_v14, %v384_v20  ;;  %v405_v25 = vadd.f32 %v398_v21, %v397_v19  ;;  %v403_v2 = vmul.f32 %v2114_v22, %v2114_v22 }
 0x1f5   :  { %v367_v26 = vpop.f32.mrf.mxu1 }
 0x1f6   :  { %v406_v28 = vadd.f32 %v405_v25, %v399_v23  ;;  %v386_v29 = vadd.f32 %v1697_v16, %v385_v24  ;;  %v401_v32 = vmul.f32 %v367_v26, %v367_v26 }
 0x1f7   :  { %v1701_v30 = vpop.f32.mrf.mxu1 }
 0x1f8   :  { %v387_v31 = vadd.f32 %v386_v29, %v367_v26  ;;  %v407_v33 = vadd.f32 %v406_v28, %v400_v27  ;;  %v404_v4 = vmul.f32 %v1701_v30, %v1701_v30 }
 0x1f9   :  { %v370_v34 = vpop.f32.mrf.mxu1 }
 0x1fa   :  { %v408_v35 = vadd.f32 %v407_v33, %v401_v32  ;;  %v388_v36 = vadd.f32 %v387_v31, %v370_v34  ;;  %v402_v37 = vmul.f32 %v370_v34, %v370_v34 }
 0x1fc   :  { %v389_v3 = vadd.f32 %v2114_v22, %v388_v36  ;;  %v409_v38 = vadd.f32 %v408_v35, %v402_v37 }
 0x1fe   :  { %v390_v39 = vadd.f32 %v1701_v30, %v389_v3  ;;  %v410_v5 = vadd.f32 %v409_v38, %v403_v2 }
 0x200   :  { %v391_v6 = vrot.slane %v390_v39, 4  ;;  %v411_v7 = vadd.f32 %v410_v5, %v404_v4 }
 0x202   :  { %v392_v40 = vadd.f32 %v391_v6, %v390_v39  ;;  %v412_v12 = vrot.slane %v411_v7, 4 }
 0x204   :  { %v393_v13 = vrot.slane %v392_v40, 2  ;;  %v413_v41 = vadd.f32 %v412_v12, %v411_v7  ;;  %v1845_v12 = vld [vmem:[#allocation2 + $0x70] sm:$0xff]  }
 0x206   :  { %v394_v42 = vadd.f32 %v393_v13, %v392_v40  ;;  %v414_v43 = vrot.slane %v413_v41, 2  ;;  %v1844_v40 = vld [vmem:[#allocation2 + $0x78] sm:$0xff]  }
 0x207   :  { %1726 = vmatprep.subr.bf16.mxu1 %v1844_v40  ;;  %v1848_v13 = vld [vmem:[#allocation2 + $0x58] sm:$0xff]  }
 0x208   :  { %v395_v44 = vrot.slane %v394_v42, 1  ;;  %v415_v46 = vadd.f32 %v414_v43, %v413_v41  ;;  %1727 = vmatpush3.bf16.msra.mxu1 %v1844_v40  ;;  %v1849_v41 = vld [vmem:[#allocation2 + $0x50] sm:$0xff]   ;;  %v1851_v43 = vld [vmem:[#allocation2 + $0x40] sm:$0xff]  }
 0x209   :  { %1728 = vmatprep.subr.bf16.mxu1 %v1845_v12 }
 0x20a   :  { %v396_v50 = vadd.f32 %v395_v44, %v394_v42  ;;  %v416_v51 = vrot.slane %v415_v46, 1  ;;  %v1850_v42 = vld [vmem:[#allocation2 + $0x48] sm:$0xff]  }
 0x20c   :  { %v417_v52 = vadd.f32 %v416_v51, %v415_v46  ;;  %v418_v53 = vmul.f32 0.015625, %v396_v50  ;;  %1729 = vmatpush3.bf16.msra.mxu1 %v1845_v12  ;;  %v593_v12 = vld [vmem:[%s2278_s2 + $0x3] sm:$0x1] }
 0x20e   :  { %v419_v54 = vmul.f32 0.015625, %v417_v52  ;;  %v420_v56 = vmul.f32 %v418_v53, %v418_v53 }
 0x210   :  { %v421_v60 = vsub.f32 %v419_v54, %v420_v56 }
 0x212   :  { %v422_v61 = vmax.f32 %v421_v60, 0.0 }
 0x214   :  { %v423_v62 = vadd.f32 1e-05, %v422_v61 }
 0x216   :  { %1878 = vrsqrt.f32 %v423_v62 }
 0x223   :  { %v1879_v0 = vpop.eup %1878 }
 0x224   :  { %v425_v1 = vmul.f32 %v1879_v0, %v382_v63 }
 0x226   :  { %v426_v9 = vmul.f32 %v425_v1, %v418_v53  ;;  %v431_v10 = vrot.slane %v425_v1, %v2068_v18 }
 0x228   :  { %v427_v11 = vsub.f32 %v383_v8, %v426_v9  ;;  %v437_v19 = vmul.f32 %v431_v10, %v370_v34  ;;  %v432_v21 = vmul.f32 %v431_v10, %v351_v15  ;;  %v433_v23 = vmul.f32 %v431_v10, %v354_v17 }
 0x229   :  { %v434_v24 = vmul.f32 %v1696_v14, %v431_v10  ;;  %v435_v25 = vmul.f32 %v1697_v16, %v431_v10  ;;  %v436_v27 = vmul.f32 %v431_v10, %v367_v26  ;;  %v438_v34 = vmul.f32 %v2114_v22, %v431_v10  ;;  %v1846_v22 = vld [vmem:[#allocation2 + $0x68] sm:$0xff]  }
 0x22a   :  { %v443_v20 = vrot.slane %v427_v11, %v2068_v18  ;;  %v439_v39 = vmul.f32 %v1701_v30, %v431_v10  ;;  %1730 = vmatprep.subr.bf16.mxu1 %v1846_v22  ;;  %v1847_v30 = vld [vmem:[#allocation2 + $0x60] sm:$0xff]  }
 0x22b   :  { %1731 = vmatpush3.bf16.msra.mxu1 %v1846_v22 }
 0x22c   :  { %v449_v28 = vadd.f32 %v443_v20, %v437_v19  ;;  %v444_v29 = vadd.f32 %v443_v20, %v432_v21  ;;  %v445_v31 = vadd.f32 %v443_v20, %v433_v23  ;;  %v446_v32 = vadd.f32 %v443_v20, %v434_v24  ;;  %1732 = vmatprep.subr.bf16.mxu1 %v1847_v30 }
 0x22d   :  { %v447_v33 = vadd.f32 %v443_v20, %v435_v25  ;;  %v448_v35 = vadd.f32 %v443_v20, %v436_v27  ;;  %v450_v14 = vadd.f32 %v443_v20, %v438_v34  ;;  %v451_v16 = vadd.f32 %v443_v20, %v439_v39 }
 0x22e   :  { %v452_v36 = vmax.f32 %v444_v29, 0.0  ;;  %v453_v37 = vmax.f32 %v445_v31, 0.0  ;;  %v454_v2 = vmax.f32 %v446_v32, 0.0  ;;  %v457_v3 = vmax.f32 %v449_v28, 0.0 }
 0x22f   :  { %v455_v38 = vmax.f32 %v447_v33, 0.0  ;;  %v456_v4 = vmax.f32 %v448_v35, 0.0  ;;  %v458_v5 = vmax.f32 %v450_v14, 0.0  ;;  %v459_v6 = vmax.f32 %v451_v16, 0.0  ;;  %1733 = vmatpush3.bf16.msra.mxu1 %v1847_v30 }
 0x230   :  { %v460_v15 = vpack.c.bf16 %v453_v37, %v452_v36  ;;  %1734 = vmatprep.subr.bf16.mxu1 %v1848_v13 }
 0x231   :  { %v461_v17 = vpack.c.bf16 %v455_v38, %v454_v2  ;;  %v462_v26 = vpack.c.bf16 %v457_v3, %v456_v4  ;;  %v463_v7 = vpack.c.bf16 %v459_v6, %v458_v5 }
 0x232   :  { %1718 = vmatprep.mubr.bf16.mxu0 %v460_v15 }
 0x233   :  { %1719 = vmatmul.mubr.bf16.vlgmr.msra.gmra.mxu0 %v461_v17  ;;  %1735 = vmatpush3.bf16.msra.mxu1 %v1848_v13  ;;  %v594_v13 = vld [vmem:[%s2278_s2 + $0x4] sm:$0x1] }
 0x234   :  { %1722 = vmatprep.mubr.bf16.mxu0 %v462_v26  ;;  %1736 = vmatprep.subr.bf16.mxu1 %v1849_v41 }
 0x237   :  { %1737 = vmatpush3.bf16.msra.mxu1 %v1849_v41 }
 0x238   :  { %1738 = vmatprep.subr.bf16.mxu1 %v1850_v42 }
 0x23b   :  { %1723 = vmatmul.mubr.bf16.gmra.mxu0 %v463_v7  ;;  %1739 = vmatpush3.bf16.msra.mxu1 %v1850_v42 }
 0x23c   :  { %1740 = vmatprep.subr.bf16.mxu1 %v1851_v43 }
 0x23f   :  { %1741 = vmatpush3.bf16.msra.mxu1 %v1851_v43 }
 0x2f3   :  { %v1720_v44 = vpop.f32.mrf.mxu0 }
 0x2f4   :  { %v610_v60 = vmul.f32 %v1720_v44, %v1720_v44 }
 0x2f5   :  { %v562_v46 = vpop.f32.mrf.mxu0 }
 0x2f6   :  { %v608_v52 = vmul.f32 %v562_v46, %v562_v46 }
 0x2f7   :  { %v1721_v50 = vpop.f32.mrf.mxu0 }
 0x2f8   :  { %v611_v0 = vmul.f32 %v1721_v50, %v1721_v50 }
 0x2f9   :  { %v565_v51 = vpop.f32.mrf.mxu0 }
 0x2fa   :  { %v595_v53 = vadd.f32 %v565_v51, %v562_v46  ;;  %v609_v54 = vmul.f32 %v565_v51, %v565_v51 }
 0x2fb   :  { %v1724_v56 = vpop.f32.mrf.mxu0 }
 0x2fc   :  { %v596_v61 = vadd.f32 %v1720_v44, %v595_v53  ;;  %v616_v62 = vadd.f32 %v609_v54, %v608_v52  ;;  %v614_v25 = vmul.f32 %v1724_v56, %v1724_v56 }
 0x2fd   :  { %v578_v63 = vpop.f32.mrf.mxu0 }
 0x2fe   :  { %v617_v1 = vadd.f32 %v616_v62, %v610_v60  ;;  %v597_v8 = vadd.f32 %v1721_v50, %v596_v61  ;;  %v612_v11 = vmul.f32 %v578_v63, %v578_v63 }
 0x2ff   :  { %v1725_v9 = vpop.f32.mrf.mxu0 }
 0x300   :  { %v598_v10 = vadd.f32 %v597_v8, %v578_v63  ;;  %v618_v19 = vadd.f32 %v617_v1, %v611_v0  ;;  %v615_v29 = vmul.f32 %v1725_v9, %v1725_v9 }
 0x301   :  { %v581_v20 = vpop.f32.mrf.mxu0 }
 0x302   :  { %v619_v21 = vadd.f32 %v618_v19, %v612_v11  ;;  %v599_v23 = vadd.f32 %v598_v10, %v581_v20  ;;  %v613_v24 = vmul.f32 %v581_v20, %v581_v20 }
 0x304   :  { %v600_v27 = vadd.f32 %v1724_v56, %v599_v23  ;;  %v620_v28 = vadd.f32 %v619_v21, %v613_v24 }
 0x306   :  { %v601_v31 = vadd.f32 %v1725_v9, %v600_v27  ;;  %v621_v32 = vadd.f32 %v620_v28, %v614_v25  ;;  %v1852_v25 = vld [vmem:[#allocation4 + $0x78] sm:$0xff]   ;;  %v1855_v27 = vld [vmem:[#allocation4 + $0x60] sm:$0xff]  }
 0x307   :  { %1750 = vmatprep.subr.bf16.mxu0 %v1852_v25  ;;  %v1856_v28 = vld [vmem:[#allocation4 + $0x58] sm:$0xff]  }
 0x308   :  { %v602_v33 = vrot.slane %v601_v31, 4  ;;  %v622_v35 = vadd.f32 %v621_v32, %v615_v29  ;;  %1751 = vmatpush3.bf16.msra.mxu0 %v1852_v25  ;;  %v1857_v29 = vld [vmem:[#allocation4 + $0x50] sm:$0xff]   ;;  %v1859_v32 = vld [vmem:[#allocation4 + $0x40] sm:$0xff]  }
 0x30a   :  { %v603_v36 = vadd.f32 %v602_v33, %v601_v31  ;;  %v623_v37 = vrot.slane %v622_v35, 4  ;;  %v1858_v31 = vld [vmem:[#allocation4 + $0x48] sm:$0xff]  }
 0x30c   :  { %v604_v2 = vrot.slane %v603_v36, 2  ;;  %v624_v3 = vadd.f32 %v623_v37, %v622_v35 }
 0x30e   :  { %v605_v38 = vadd.f32 %v604_v2, %v603_v36  ;;  %v625_v4 = vrot.slane %v624_v3, 2 }
 0x310   :  { %v606_v34 = vrot.slane %v605_v38, 1  ;;  %v626_v39 = vadd.f32 %v625_v4, %v624_v3 }
 0x312   :  { %v607_v15 = vadd.f32 %v606_v34, %v605_v38  ;;  %v627_v17 = vrot.slane %v626_v39, 1 }
 0x314   :  { %v628_v14 = vadd.f32 %v627_v17, %v626_v39  ;;  %v629_v16 = vmul.f32 0.015625, %v607_v15 }
 0x316   :  { %v630_v26 = vmul.f32 0.015625, %v628_v14  ;;  %v631_v5 = vmul.f32 %v629_v16, %v629_v16 }
 0x318   :  { %v632_v6 = vsub.f32 %v630_v26, %v631_v5 }
 0x31a   :  { %v633_v7 = vmax.f32 %v632_v6, 0.0 }
 0x31c   :  { %v634_v40 = vadd.f32 1e-05, %v633_v7 }
 0x31e   :  { %1880 = vrsqrt.f32 %v634_v40 }
 0x32b   :  { %v1881_v22 = vpop.eup %1880 }
 0x32c   :  { %v636_v30 = vmul.f32 %v1881_v22, %v593_v12 }
 0x32e   :  { %v637_v41 = vmul.f32 %v636_v30, %v629_v16  ;;  %v642_v42 = vrot.slane %v636_v30, %v2068_v18 }
 0x330   :  { %v638_v43 = vsub.f32 %v594_v13, %v637_v41  ;;  %v648_v52 = vmul.f32 %v642_v42, %v581_v20  ;;  %v643_v53 = vmul.f32 %v642_v42, %v562_v46  ;;  %v644_v54 = vmul.f32 %v642_v42, %v565_v51 }
 0x331   :  { %v645_v60 = vmul.f32 %v1720_v44, %v642_v42  ;;  %v646_v61 = vmul.f32 %v1721_v50, %v642_v42  ;;  %v647_v62 = vmul.f32 %v642_v42, %v578_v63  ;;  %v649_v0 = vmul.f32 %v1724_v56, %v642_v42 }
 0x332   :  { %v656_v1 = vadd.f32 %v648_v52, %v2106_v58  ;;  %v662_v8 = vrot.slane %v638_v43, %v2068_v18  ;;  %v651_v10 = vadd.f32 %v643_v53, %v2092_v47  ;;  %v652_v11 = vadd.f32 %v644_v54, %v2094_v48 }
 0x333   :  { %v653_v19 = vadd.f32 %v645_v60, %v2096_v49  ;;  %v654_v21 = vadd.f32 %v646_v61, %v2090_v45  ;;  %v655_v20 = vadd.f32 %v647_v62, %v2104_v57  ;;  %v650_v46 = vmul.f32 %v1725_v9, %v642_v42 }
 0x334   :  { %v2142_v51 = vadd.f32 %v662_v8, %v651_v10  ;;  %v2144_v44 = vadd.f32 %v662_v8, %v652_v11  ;;  %v2146_v50 = vadd.f32 %v662_v8, %v656_v1  ;;  %v657_v49 = vadd.f32 %v649_v0, %v2108_v59  ;;  %v1853_v59 = vld [vmem:[#allocation4 + $0x70] sm:$0xff]  }
 0x335   :  { %v2148_v58 = vadd.f32 %v662_v8, %v653_v19  ;;  %v2150_v56 = vadd.f32 %v662_v8, %v654_v21  ;;  %v2152_v47 = vadd.f32 %v662_v8, %v655_v20  ;;  %v658_v57 = vadd.f32 %v650_v46, %v2102_v55  ;;  %1752 = vmatprep.subr.bf16.mxu0 %v1853_v59  ;;  %v1854_v55 = vld [vmem:[#allocation4 + $0x68] sm:$0xff]  }
 0x336   :  { %v671_v48 = vpack.c.bf16 %v2144_v44, %v2142_v51  ;;  %v2162_v9 = vadd.f32 %v662_v8, %v657_v49  ;;  %1753 = vmatpush3.bf16.msra.mxu0 %v1853_v59  ;;  %v805_v59 = vld [vmem:[%s2278_s2 + $0x5] sm:$0x1] }
 0x337   :  { %v672_v45 = vpack.c.bf16 %v2150_v56, %v2148_v58  ;;  %v673_v63 = vpack.c.bf16 %v2146_v50, %v2152_v47  ;;  %v2164_v23 = vadd.f32 %v662_v8, %v658_v57  ;;  %1754 = vmatprep.subr.bf16.mxu0 %v1854_v55 }
 0x338   :  { %1742 = vmatprep.mubr.bf16.mxu1 %v671_v48 }
 0x339   :  { %1743 = vmatmul.mubr.bf16.vlgmr.msra.gmra.mxu1 %v672_v45  ;;  %v674_v24 = vpack.c.bf16 %v2164_v23, %v2162_v9 }
 0x33a   :  { %1746 = vmatprep.mubr.bf16.mxu1 %v673_v63  ;;  %1755 = vmatpush3.bf16.msra.mxu0 %v1854_v55 }
 0x33b   :  { %1756 = vmatprep.subr.bf16.mxu0 %v1855_v27 }
 0x33e   :  { %1757 = vmatpush3.bf16.msra.mxu0 %v1855_v27 }
 0x33f   :  { %1758 = vmatprep.subr.bf16.mxu0 %v1856_v28 }
 0x341   :  { %1747 = vmatmul.mubr.bf16.gmra.mxu1 %v674_v24 }
 0x342   :  { %1759 = vmatpush3.bf16.msra.mxu0 %v1856_v28  ;;  %v806_v28 = vld [vmem:[%s2278_s2 + $0x6] sm:$0x1] }
 0x343   :  { %1760 = vmatprep.subr.bf16.mxu0 %v1857_v29 }
 0x346   :  { %1761 = vmatpush3.bf16.msra.mxu0 %v1857_v29 }
 0x347   :  { %1762 = vmatprep.subr.bf16.mxu0 %v1858_v31 }
 0x34a   :  { %1763 = vmatpush3.bf16.msra.mxu0 %v1858_v31 }
 0x34b   :  { %1764 = vmatprep.subr.bf16.mxu0 %v1859_v32 }
 0x34e   :  { %1765 = vmatpush3.bf16.msra.mxu0 %v1859_v32 }
 0x3f9   :  { %v1744_v33 = vpop.f32.mrf.mxu1 }
 0x3fa   :  { %v822_v34 = vmul.f32 %v1744_v33, %v1744_v33 }
 0x3fb   :  { %v774_v35 = vpop.f32.mrf.mxu1 }
 0x3fc   :  { %v820_v2 = vmul.f32 %v774_v35, %v774_v35 }
 0x3fd   :  { %v1745_v36 = vpop.f32.mrf.mxu1 }
 0x3fe   :  { %v823_v14 = vmul.f32 %v1745_v36, %v1745_v36 }
 0x3ff   :  { %v777_v37 = vpop.f32.mrf.mxu1 }
 0x400   :  { %v807_v3 = vadd.f32 %v777_v37, %v774_v35  ;;  %v821_v38 = vmul.f32 %v777_v37, %v777_v37 }
 0x401   :  { %v2168_v4 = vpop.f32.mrf.mxu1 }
 0x402   :  { %v808_v39 = vadd.f32 %v1744_v33, %v807_v3  ;;  %v828_v15 = vadd.f32 %v821_v38, %v820_v2  ;;  %v826_v41 = vmul.f32 %v2168_v4, %v2168_v4 }
 0x403   :  { %v790_v17 = vpop.f32.mrf.mxu1 }
 0x404   :  { %v829_v16 = vadd.f32 %v828_v15, %v822_v34  ;;  %v809_v26 = vadd.f32 %v1745_v36, %v808_v39  ;;  %v824_v7 = vmul.f32 %v790_v17, %v790_v17 }
 0x405   :  { %v1749_v5 = vpop.f32.mrf.mxu1 }
 0x406   :  { %v810_v6 = vadd.f32 %v809_v26, %v790_v17  ;;  %v830_v40 = vadd.f32 %v829_v16, %v823_v14  ;;  %v827_v52 = vmul.f32 %v1749_v5, %v1749_v5 }
 0x407   :  { %v793_v12 = vpop.f32.mrf.mxu1 }
 0x408   :  { %v831_v22 = vadd.f32 %v830_v40, %v824_v7  ;;  %v811_v30 = vadd.f32 %v810_v6, %v793_v12  ;;  %v825_v13 = vmul.f32 %v793_v12, %v793_v12 }
 0x40a   :  { %v812_v42 = vadd.f32 %v2168_v4, %v811_v30  ;;  %v832_v43 = vadd.f32 %v831_v22, %v825_v13 }
 0x40c   :  { %v813_v53 = vadd.f32 %v1749_v5, %v812_v42  ;;  %v833_v54 = vadd.f32 %v832_v43, %v826_v41 }
 0x40e   :  { %v814_v60 = vrot.slane %v813_v53, 4  ;;  %v834_v61 = vadd.f32 %v833_v54, %v827_v52 }
 0x410   :  { %v815_v62 = vadd.f32 %v814_v60, %v813_v53  ;;  %v835_v0 = vrot.slane %v834_v61, 4 }
 0x412   :  { %v816_v1 = vrot.slane %v815_v62, 2  ;;  %v836_v8 = vadd.f32 %v835_v0, %v834_v61  ;;  %v1861_v0 = vld [vmem:[#allocation2 + $0xb0] sm:$0xff]  }
 0x414   :  { %v817_v10 = vadd.f32 %v816_v1, %v815_v62  ;;  %v837_v11 = vrot.slane %v836_v8, 2  ;;  %v1860_v62 = vld [vmem:[#allocation2 + $0xb8] sm:$0xff]  }
 0x415   :  { %1774 = vmatprep.subr.bf16.mxu1 %v1860_v62  ;;  %v1864_v1 = vld [vmem:[#allocation2 + $0x98] sm:$0xff]  }
 0x416   :  { %v818_v19 = vrot.slane %v817_v10, 1  ;;  %v838_v21 = vadd.f32 %v837_v11, %v836_v8  ;;  %1775 = vmatpush3.bf16.msra.mxu1 %v1860_v62  ;;  %v1865_v8 = vld [vmem:[#allocation2 + $0x90] sm:$0xff]   ;;  %v1867_v11 = vld [vmem:[#allocation2 + $0x80] sm:$0xff]  }
 0x417   :  { %1776 = vmatprep.subr.bf16.mxu1 %v1861_v0 }
 0x418   :  { %v819_v20 = vadd.f32 %v818_v19, %v817_v10  ;;  %v839_v46 = vrot.slane %v838_v21, 1  ;;  %v1866_v10 = vld [vmem:[#allocation2 + $0x88] sm:$0xff]  }
 0x41a   :  { %v840_v48 = vadd.f32 %v839_v46, %v838_v21  ;;  %v841_v45 = vmul.f32 0.015625, %v819_v20  ;;  %1777 = vmatpush3.bf16.msra.mxu1 %v1861_v0  ;;  %v1017_v0 = vld [vmem:[%s2278_s2 + $0x7] sm:$0x1] }
 0x41c   :  { %v842_v49 = vmul.f32 0.015625, %v840_v48  ;;  %v843_v57 = vmul.f32 %v841_v45, %v841_v45 }
 0x41e   :  { %v844_v63 = vsub.f32 %v842_v49, %v843_v57 }
 0x420   :  { %v845_v24 = vmax.f32 %v844_v63, 0.0 }
 0x422   :  { %v846_v25 = vadd.f32 1e-05, %v845_v24 }
 0x424   :  { %1882 = vrsqrt.f32 %v846_v25 }
 0x431   :  { %v1883_v55 = vpop.eup %1882 }
 0x432   :  { %v848_v27 = vmul.f32 %v1883_v55, %v805_v59 }
 0x434   :  { %v849_v29 = vmul.f32 %v848_v27, %v841_v45  ;;  %v854_v31 = vrot.slane %v848_v27, %v2068_v18 }
 0x436   :  { %v850_v32 = vsub.f32 %v806_v28, %v849_v29  ;;  %v860_v2 = vmul.f32 %v854_v31, %v793_v12  ;;  %v855_v38 = vmul.f32 %v854_v31, %v774_v35  ;;  %v856_v34 = vmul.f32 %v854_v31, %v777_v37 }
 0x437   :  { %v857_v39 = vmul.f32 %v1744_v33, %v854_v31  ;;  %v858_v15 = vmul.f32 %v1745_v36, %v854_v31  ;;  %v859_v14 = vmul.f32 %v854_v31, %v790_v17  ;;  %v861_v12 = vmul.f32 %v2168_v4, %v854_v31  ;;  %v1862_v4 = vld [vmem:[#allocation2 + $0xa8] sm:$0xff]  }
 0x438   :  { %v866_v3 = vrot.slane %v850_v32, %v2068_v18  ;;  %v862_v53 = vmul.f32 %v1749_v5, %v854_v31  ;;  %1778 = vmatprep.subr.bf16.mxu1 %v1862_v4  ;;  %v1863_v5 = vld [vmem:[#allocation2 + $0xa0] sm:$0xff]  }
 0x439   :  { %1779 = vmatpush3.bf16.msra.mxu1 %v1862_v4 }
 0x43a   :  { %v872_v16 = vadd.f32 %v866_v3, %v860_v2  ;;  %v867_v26 = vadd.f32 %v866_v3, %v855_v38  ;;  %v868_v6 = vadd.f32 %v866_v3, %v856_v34  ;;  %v869_v7 = vadd.f32 %v866_v3, %v857_v39  ;;  %1780 = vmatprep.subr.bf16.mxu1 %v1863_v5 }
 0x43b   :  { %v870_v40 = vadd.f32 %v866_v3, %v858_v15  ;;  %v871_v22 = vadd.f32 %v866_v3, %v859_v14  ;;  %v873_v33 = vadd.f32 %v866_v3, %v861_v12  ;;  %v874_v36 = vadd.f32 %v866_v3, %v862_v53 }
 0x43c   :  { %v875_v30 = vmax.f32 %v867_v26, 0.0  ;;  %v876_v13 = vmax.f32 %v868_v6, 0.0  ;;  %v877_v41 = vmax.f32 %v869_v7, 0.0  ;;  %v880_v42 = vmax.f32 %v872_v16, 0.0 }
 0x43d   :  { %v878_v43 = vmax.f32 %v870_v40, 0.0  ;;  %v879_v52 = vmax.f32 %v871_v22, 0.0  ;;  %v881_v54 = vmax.f32 %v873_v33, 0.0  ;;  %v882_v60 = vmax.f32 %v874_v36, 0.0  ;;  %1781 = vmatpush3.bf16.msra.mxu1 %v1863_v5 }
 0x43e   :  { %v883_v35 = vpack.c.bf16 %v876_v13, %v875_v30  ;;  %1782 = vmatprep.subr.bf16.mxu1 %v1864_v1 }
 0x43f   :  { %v884_v37 = vpack.c.bf16 %v878_v43, %v877_v41  ;;  %v885_v17 = vpack.c.bf16 %v880_v42, %v879_v52  ;;  %v886_v61 = vpack.c.bf16 %v882_v60, %v881_v54 }
 0x440   :  { %1766 = vmatprep.mubr.bf16.mxu0 %v883_v35 }
 0x441   :  { %1767 = vmatmul.mubr.bf16.vlgmr.msra.gmra.mxu0 %v884_v37  ;;  %1783 = vmatpush3.bf16.msra.mxu1 %v1864_v1  ;;  %v1018_v1 = vld [vmem:[%s2278_s2 + $0x8] sm:$0x1] }
 0x442   :  { %1770 = vmatprep.mubr.bf16.mxu0 %v885_v17  ;;  %1784 = vmatprep.subr.bf16.mxu1 %v1865_v8 }
 0x445   :  { %1785 = vmatpush3.bf16.msra.mxu1 %v1865_v8 }
 0x446   :  { %1786 = vmatprep.subr.bf16.mxu1 %v1866_v10 }
 0x449   :  { %1771 = vmatmul.mubr.bf16.gmra.mxu0 %v886_v61  ;;  %1787 = vmatpush3.bf16.msra.mxu1 %v1866_v10 }
 0x44a   :  { %1788 = vmatprep.subr.bf16.mxu1 %v1867_v11 }
 0x44d   :  { %1789 = vmatpush3.bf16.msra.mxu1 %v1867_v11 }
 0x501   :  { %v1768_v19 = vpop.f32.mrf.mxu0 }
 0x502   :  { %v1034_v63 = vmul.f32 %v1768_v19, %v1768_v19 }
 0x503   :  { %v986_v21 = vpop.f32.mrf.mxu0 }
 0x504   :  { %v1032_v48 = vmul.f32 %v986_v21, %v986_v21 }
 0x505   :  { %v1769_v20 = vpop.f32.mrf.mxu0 }
 0x506   :  { %v1035_v55 = vmul.f32 %v1769_v20, %v1769_v20 }
 0x507   :  { %v989_v46 = vpop.f32.mrf.mxu0 }
 0x508   :  { %v1019_v45 = vadd.f32 %v989_v46, %v986_v21  ;;  %v1033_v49 = vmul.f32 %v989_v46, %v989_v46 }
 0x509   :  { %v1772_v57 = vpop.f32.mrf.mxu0 }
 0x50a   :  { %v1020_v24 = vadd.f32 %v1768_v19, %v1019_v45  ;;  %v1040_v25 = vadd.f32 %v1033_v49, %v1032_v48  ;;  %v1038_v15 = vmul.f32 %v1772_v57, %v1772_v57 }
 0x50b   :  { %v1002_v59 = vpop.f32.mrf.mxu0 }
 0x50c   :  { %v1041_v27 = vadd.f32 %v1040_v25, %v1034_v63  ;;  %v1021_v28 = vadd.f32 %v1769_v20, %v1020_v24  ;;  %v1036_v32 = vmul.f32 %v1002_v59, %v1002_v59 }
 0x50d   :  { %v1773_v29 = vpop.f32.mrf.mxu0 }
 0x50e   :  { %v1022_v31 = vadd.f32 %v1021_v28, %v1002_v59  ;;  %v1042_v2 = vadd.f32 %v1041_v27, %v1035_v55  ;;  %v1039_v26 = vmul.f32 %v1773_v29, %v1773_v29 }
 0x50f   :  { %v1005_v3 = vpop.f32.mrf.mxu0 }
 0x510   :  { %v1043_v38 = vadd.f32 %v1042_v2, %v1036_v32  ;;  %v1023_v34 = vadd.f32 %v1022_v31, %v1005_v3  ;;  %v1037_v39 = vmul.f32 %v1005_v3, %v1005_v3 }
 0x512   :  { %v1024_v14 = vadd.f32 %v1772_v57, %v1023_v34  ;;  %v1044_v16 = vadd.f32 %v1043_v38, %v1037_v39 }
 0x514   :  { %v1025_v6 = vadd.f32 %v1773_v29, %v1024_v14  ;;  %v1045_v7 = vadd.f32 %v1044_v16, %v1038_v15  ;;  %v1868_v15 = vld [vmem:[#allocation4 + $0xb8] sm:$0xff]   ;;  %v1871_v14 = vld [vmem:[#allocation4 + $0xa0] sm:$0xff]  }
 0x515   :  { %1798 = vmatprep.subr.bf16.mxu0 %v1868_v15  ;;  %v1872_v16 = vld [vmem:[#allocation4 + $0x98] sm:$0xff]  }
 0x516   :  { %v1026_v40 = vrot.slane %v1025_v6, 4  ;;  %v1046_v22 = vadd.f32 %v1045_v7, %v1039_v26  ;;  %1799 = vmatpush3.bf16.msra.mxu0 %v1868_v15  ;;  %v1873_v26 = vld [vmem:[#allocation4 + $0x90] sm:$0xff]   ;;  %v1875_v7 = vld [vmem:[#allocation4 + $0x80] sm:$0xff]  }
 0x518   :  { %v1027_v30 = vadd.f32 %v1026_v40, %v1025_v6  ;;  %v1047_v13 = vrot.slane %v1046_v22, 4  ;;  %v1874_v6 = vld [vmem:[#allocation4 + $0x88] sm:$0xff]  }
 0x51a   :  { %v1028_v41 = vrot.slane %v1027_v30, 2  ;;  %v1048_v42 = vadd.f32 %v1047_v13, %v1046_v22 }
 0x51c   :  { %v1029_v43 = vadd.f32 %v1028_v41, %v1027_v30  ;;  %v1049_v52 = vrot.slane %v1048_v42, 2 }
 0x51e   :  { %v1030_v12 = vrot.slane %v1029_v43, 1  ;;  %v1050_v53 = vadd.f32 %v1049_v52, %v1048_v42 }
 0x520   :  { %v1031_v35 = vadd.f32 %v1030_v12, %v1029_v43  ;;  %v1051_v37 = vrot.slane %v1050_v53, 1 }
 0x522   :  { %v1052_v33 = vadd.f32 %v1051_v37, %v1050_v53  ;;  %v1053_v36 = vmul.f32 0.015625, %v1031_v35 }
 0x524   :  { %v1054_v17 = vmul.f32 0.015625, %v1052_v33  ;;  %v1055_v54 = vmul.f32 %v1053_v36, %v1053_v36 }
 0x526   :  { %v1056_v60 = vsub.f32 %v1054_v17, %v1055_v54 }
 0x528   :  { %v1057_v61 = vmax.f32 %v1056_v60, 0.0 }
 0x52a   :  { %v1058_v62 = vadd.f32 1e-05, %v1057_v61 }
 0x52c   :  { %1884 = vrsqrt.f32 %v1058_v62 }
 0x539   :  { %v1885_v4 = vpop.eup %1884 }
 0x53a   :  { %v1060_v5 = vmul.f32 %v1885_v4, %v1017_v0 }
 0x53c   :  { %v1061_v8 = vmul.f32 %v1060_v5, %v1053_v36  ;;  %v1066_v10 = vrot.slane %v1060_v5, %v2068_v18 }
 0x53e   :  { %v1062_v11 = vsub.f32 %v1018_v1, %v1061_v8  ;;  %v1072_v48 = vmul.f32 %v1066_v10, %v1005_v3  ;;  %v1067_v45 = vmul.f32 %v1066_v10, %v986_v21  ;;  %v1068_v49 = vmul.f32 %v1066_v10, %v989_v46 }
 0x53f   :  { %v1069_v63 = vmul.f32 %v1768_v19, %v1066_v10  ;;  %v1070_v24 = vmul.f32 %v1769_v20, %v1066_v10  ;;  %v1071_v25 = vmul.f32 %v1066_v10, %v1002_v59  ;;  %v1073_v55 = vmul.f32 %v1772_v57, %v1066_v10 }
 0x540   :  { %v1080_v27 = vadd.f32 %v1072_v48, %v2146_v50  ;;  %v1086_v28 = vrot.slane %v1062_v11, %v2068_v18  ;;  %v1075_v31 = vadd.f32 %v1067_v45, %v2142_v51  ;;  %v1076_v32 = vadd.f32 %v1068_v49, %v2144_v44 }
 0x541   :  { %v1077_v2 = vadd.f32 %v1069_v63, %v2148_v58  ;;  %v1078_v38 = vadd.f32 %v1070_v24, %v2150_v56  ;;  %v1079_v3 = vadd.f32 %v1071_v25, %v2152_v47  ;;  %v1074_v21 = vmul.f32 %v1773_v29, %v1066_v10 }
 0x542   :  { %v2196_v46 = vadd.f32 %v1086_v28, %v1075_v31  ;;  %v2198_v19 = vadd.f32 %v1086_v28, %v1076_v32  ;;  %v2200_v20 = vadd.f32 %v1086_v28, %v1080_v27  ;;  %v1081_v56 = vadd.f32 %v1073_v55, %v2162_v9  ;;  %v1869_v9 = vld [vmem:[#allocation4 + $0xb0] sm:$0xff]  }
 0x543   :  { %v2202_v50 = vadd.f32 %v1086_v28, %v1077_v2  ;;  %v2204_v57 = vadd.f32 %v1086_v28, %v1078_v38  ;;  %v2206_v51 = vadd.f32 %v1086_v28, %v1079_v3  ;;  %v1082_v47 = vadd.f32 %v1074_v21, %v2164_v23  ;;  %1800 = vmatprep.subr.bf16.mxu0 %v1869_v9  ;;  %v1870_v23 = vld [vmem:[#allocation4 + $0xa8] sm:$0xff]  }
 0x544   :  { %v1095_v44 = vpack.c.bf16 %v2198_v19, %v2196_v46  ;;  %v2216_v29 = vadd.f32 %v1086_v28, %v1081_v56  ;;  %1801 = vmatpush3.bf16.msra.mxu0 %v1869_v9  ;;  %v1229_v9 = vld [vmem:[%s2278_s2 + $0x9] sm:$0x1] }
 0x545   :  { %v1096_v58 = vpack.c.bf16 %v2204_v57, %v2202_v50  ;;  %v1097_v59 = vpack.c.bf16 %v2200_v20, %v2206_v51  ;;  %v2218_v34 = vadd.f32 %v1086_v28, %v1082_v47  ;;  %1802 = vmatprep.subr.bf16.mxu0 %v1870_v23 }
 0x546   :  { %1790 = vmatprep.mubr.bf16.mxu1 %v1095_v44 }
 0x547   :  { %1791 = vmatmul.mubr.bf16.vlgmr.msra.gmra.mxu1 %v1096_v58  ;;  %v1098_v39 = vpack.c.bf16 %v2218_v34, %v2216_v29 }
 0x548   :  { %1794 = vmatprep.mubr.bf16.mxu1 %v1097_v59  ;;  %1803 = vmatpush3.bf16.msra.mxu0 %v1870_v23 }
 0x549   :  { %1804 = vmatprep.subr.bf16.mxu0 %v1871_v14 }
 0x54c   :  { %1805 = vmatpush3.bf16.msra.mxu0 %v1871_v14 }
 0x54d   :  { %1806 = vmatprep.subr.bf16.mxu0 %v1872_v16 }
 0x54f   :  { %1795 = vmatmul.mubr.bf16.gmra.mxu1 %v1098_v39 }
 0x550   :  { %1807 = vmatpush3.bf16.msra.mxu0 %v1872_v16  ;;  %v1230_v16 = vld [vmem:[%s2278_s2 + $0xa] sm:$0x1] }
 0x551   :  { %1808 = vmatprep.subr.bf16.mxu0 %v1873_v26 }
 0x554   :  { %1809 = vmatpush3.bf16.msra.mxu0 %v1873_v26 }
 0x555   :  { %1810 = vmatprep.subr.bf16.mxu0 %v1874_v6 }
 0x558   :  { %1811 = vmatpush3.bf16.msra.mxu0 %v1874_v6 }
 0x559   :  { %1812 = vmatprep.subr.bf16.mxu0 %v1875_v7 }
 0x55c   :  { %1813 = vmatpush3.bf16.msra.mxu0 %v1875_v7 }
 0x607   :  { %v1792_v40 = vpop.f32.mrf.mxu1 }
 0x608   :  { %v1246_v12 = vmul.f32 %v1792_v40, %v1792_v40 }
 0x609   :  { %v1198_v22 = vpop.f32.mrf.mxu1 }
 0x60a   :  { %v1244_v41 = vmul.f32 %v1198_v22, %v1198_v22 }
 0x60b   :  { %v1793_v30 = vpop.f32.mrf.mxu1 }
 0x60c   :  { %v1247_v33 = vmul.f32 %v1793_v30, %v1793_v30 }
 0x60d   :  { %v1201_v13 = vpop.f32.mrf.mxu1 }
 0x60e   :  { %v1231_v42 = vadd.f32 %v1201_v13, %v1198_v22  ;;  %v1245_v43 = vmul.f32 %v1201_v13, %v1201_v13 }
 0x60f   :  { %v2222_v52 = vpop.f32.mrf.mxu1 }
 0x610   :  { %v1232_v53 = vadd.f32 %v1792_v40, %v1231_v42  ;;  %v1252_v35 = vadd.f32 %v1245_v43, %v1244_v41  ;;  %v1250_v8 = vmul.f32 %v2222_v52, %v2222_v52 }
 0x611   :  { %v1214_v37 = vpop.f32.mrf.mxu1 }
 0x612   :  { %v1253_v36 = vadd.f32 %v1252_v35, %v1246_v12  ;;  %v1233_v17 = vadd.f32 %v1793_v30, %v1232_v53  ;;  %v1248_v61 = vmul.f32 %v1214_v37, %v1214_v37 }
 0x613   :  { %v1797_v54 = vpop.f32.mrf.mxu1 }
 0x614   :  { %v1234_v60 = vadd.f32 %v1233_v17, %v1214_v37  ;;  %v1254_v62 = vadd.f32 %v1253_v36, %v1247_v33  ;;  %v1251_v48 = vmul.f32 %v1797_v54, %v1797_v54 }
 0x615   :  { %v1217_v0 = vpop.f32.mrf.mxu1 }
 0x616   :  { %v1255_v4 = vadd.f32 %v1254_v62, %v1248_v61  ;;  %v1235_v5 = vadd.f32 %v1234_v60, %v1217_v0  ;;  %v1249_v1 = vmul.f32 %v1217_v0, %v1217_v0 }
 0x618   :  { %v1236_v10 = vadd.f32 %v2222_v52, %v1235_v5  ;;  %v1256_v11 = vadd.f32 %v1255_v4, %v1249_v1 }
 0x61a   :  { %v1237_v45 = vadd.f32 %v1797_v54, %v1236_v10  ;;  %v1257_v49 = vadd.f32 %v1256_v11, %v1250_v8 }
 0x61c   :  { %v1238_v63 = vrot.slane %v1237_v45, 4  ;;  %v1258_v24 = vadd.f32 %v1257_v49, %v1251_v48 }
 0x61e   :  { %v1239_v25 = vadd.f32 %v1238_v63, %v1237_v45  ;;  %v1259_v55 = vrot.slane %v1258_v24, 4 }
 0x620   :  { %v1240_v27 = vrot.slane %v1239_v25, 2  ;;  %v1260_v28 = vadd.f32 %v1259_v55, %v1258_v24 }
 0x622   :  { %v1241_v31 = vadd.f32 %v1240_v27, %v1239_v25  ;;  %v1261_v32 = vrot.slane %v1260_v28, 2 }
 0x624   :  { %v1242_v2 = vrot.slane %v1241_v31, 1  ;;  %v1262_v38 = vadd.f32 %v1261_v32, %v1260_v28 }
 0x626   :  { %v1243_v3 = vadd.f32 %v1242_v2, %v1241_v31  ;;  %v1263_v21 = vrot.slane %v1262_v38, 1 }
 0x628   :  { %v1264_v44 = vadd.f32 %v1263_v21, %v1262_v38  ;;  %v1265_v58 = vmul.f32 0.015625, %v1243_v3 }
 0x62a   :  { %v1266_v56 = vmul.f32 0.015625, %v1264_v44  ;;  %v1267_v47 = vmul.f32 %v1265_v58, %v1265_v58 }
 0x62c   :  { %v1268_v59 = vsub.f32 %v1266_v56, %v1267_v47 }
 0x62e   :  { %v1269_v39 = vmax.f32 %v1268_v59, 0.0 }
 0x630   :  { %v1270_v15 = vadd.f32 1e-05, %v1269_v39 }
 0x632   :  { %1886 = vrsqrt.f32 %v1270_v15 }
 0x63f   :  { %v1887_v23 = vpop.eup %1886 }
 0x640   :  { %v1272_v14 = vmul.f32 %v1887_v23, %v1229_v9 }
 0x642   :  { %v1273_v26 = vmul.f32 %v1272_v14, %v1265_v58  ;;  %v1278_v6 = vrot.slane %v1272_v14, %v2068_v18 }
 0x644   :  { %v1274_v7 = vsub.f32 %v1230_v16, %v1273_v26  ;;  %v1284_v41 = vmul.f32 %v1278_v6, %v1217_v0  ;;  %v1279_v43 = vmul.f32 %v1278_v6, %v1198_v22  ;;  %v1280_v12 = vmul.f32 %v1278_v6, %v1201_v13 }
 0x645   :  { %v1281_v53 = vmul.f32 %v1792_v40, %v1278_v6  ;;  %v1282_v35 = vmul.f32 %v1793_v30, %v1278_v6  ;;  %v1283_v33 = vmul.f32 %v1278_v6, %v1214_v37  ;;  %v1285_v0 = vmul.f32 %v2222_v52, %v1278_v6 }
 0x646   :  { %v1290_v42 = vrot.slane %v1274_v7, %v2068_v18  ;;  %v1286_v45 = vmul.f32 %v1797_v54, %v1278_v6 }
 0x648   :  { %v1296_v36 = vadd.f32 %v1290_v42, %v1284_v41  ;;  %v1291_v17 = vadd.f32 %v1290_v42, %v1279_v43  ;;  %v1292_v60 = vadd.f32 %v1290_v42, %v1280_v12  ;;  %v1293_v61 = vadd.f32 %v1290_v42, %v1281_v53 }
 0x649   :  { %v1294_v62 = vadd.f32 %v1290_v42, %v1282_v35  ;;  %v1295_v4 = vadd.f32 %v1290_v42, %v1283_v33  ;;  %v1297_v40 = vadd.f32 %v1290_v42, %v1285_v0  ;;  %v1298_v30 = vadd.f32 %v1290_v42, %v1286_v45 }
 0x64a   :  { %v1304_v5 = vmax.f32 %v1296_v36, 0.0  ;;  %v1299_v1 = vmax.f32 %v1291_v17, 0.0  ;;  %v1300_v8 = vmax.f32 %v1292_v60, 0.0  ;;  %v1301_v10 = vmax.f32 %v1293_v61, 0.0 }
 0x64b   :  { %v1302_v11 = vmax.f32 %v1294_v62, 0.0  ;;  %v1303_v48 = vmax.f32 %v1295_v4, 0.0  ;;  %v1305_v49 = vmax.f32 %v1297_v40, 0.0  ;;  %v1306_v63 = vmax.f32 %v1298_v30, 0.0 }
 0x64c   :  { %v1307_v22 = vpack.c.bf16 %v1300_v8, %v1299_v1 }
 0x64d   :  { %v1308_v13 = vpack.c.bf16 %v1302_v11, %v1301_v10  ;;  %v1309_v37 = vpack.c.bf16 %v1304_v5, %v1303_v48  ;;  %v1310_v24 = vpack.c.bf16 %v1306_v63, %v1305_v49 }
 0x64e   :  { %1814 = vmatprep.mubr.bf16.mxu0 %v1307_v22 }
 0x64f   :  { %1815 = vmatmul.mubr.bf16.vlgmr.msra.gmra.mxu0 %v1308_v13  ;;  %v1441_v13 = vld [vmem:[%s2278_s2 + $0xb] sm:$0x1] }
 0x650   :  { %1818 = vmatprep.mubr.bf16.mxu0 %v1309_v37  ;;  %v1442_v37 = vld [vmem:[%s2278_s2 + $0xc] sm:$0x1] }
 0x657   :  { %1819 = vmatmul.mubr.bf16.gmra.mxu0 %v1310_v24 }
 0x70f   :  { %v1816_v25 = vpop.f32.mrf.mxu0 }
 0x710   :  { %v1458_v2 = vmul.f32 %v1816_v25, %v1816_v25 }
 0x711   :  { %v1410_v55 = vpop.f32.mrf.mxu0 }
 0x712   :  { %v1456_v31 = vmul.f32 %v1410_v55, %v1410_v55 }
 0x713   :  { %v1817_v27 = vpop.f32.mrf.mxu0 }
 0x714   :  { %v1459_v44 = vmul.f32 %v1817_v27, %v1817_v27 }
 0x715   :  { %v1413_v28 = vpop.f32.mrf.mxu0 }
 0x716   :  { %v1443_v32 = vadd.f32 %v1413_v28, %v1410_v55  ;;  %v1457_v52 = vmul.f32 %v1413_v28, %v1413_v28 }
 0x717   :  { %v1820_v54 = vpop.f32.mrf.mxu0 }
 0x718   :  { %v1444_v38 = vadd.f32 %v1816_v25, %v1443_v32  ;;  %v1464_v3 = vadd.f32 %v1457_v52, %v1456_v31  ;;  %v1462_v26 = vmul.f32 %v1820_v54, %v1820_v54 }
 0x719   :  { %v1426_v21 = vpop.f32.mrf.mxu0 }
 0x71a   :  { %v1465_v58 = vadd.f32 %v1464_v3, %v1458_v2  ;;  %v1445_v56 = vadd.f32 %v1817_v27, %v1444_v38  ;;  %v1460_v39 = vmul.f32 %v1426_v21, %v1426_v21 }
 0x71b   :  { %v1821_v47 = vpop.f32.mrf.mxu0 }
 0x71c   :  { %v1446_v59 = vadd.f32 %v1445_v56, %v1426_v21  ;;  %v1466_v15 = vadd.f32 %v1465_v58, %v1459_v44  ;;  %v1463_v41 = vmul.f32 %v1821_v47, %v1821_v47 }
 0x71d   :  { %v1429_v9 = vpop.f32.mrf.mxu0 }
 0x71e   :  { %v1467_v23 = vadd.f32 %v1466_v15, %v1460_v39  ;;  %v1447_v14 = vadd.f32 %v1446_v59, %v1429_v9  ;;  %v1461_v16 = vmul.f32 %v1429_v9, %v1429_v9 }
 0x720   :  { %v1448_v6 = vadd.f32 %v1820_v54, %v1447_v14  ;;  %v1468_v7 = vadd.f32 %v1467_v23, %v1461_v16 }
 0x722   :  { %v1449_v42 = vadd.f32 %v1821_v47, %v1448_v6  ;;  %v1469_v43 = vadd.f32 %v1468_v7, %v1462_v26 }
 0x724   :  { %v1450_v12 = vrot.slane %v1449_v42, 4  ;;  %v1470_v53 = vadd.f32 %v1469_v43, %v1463_v41 }
 0x726   :  { %v1451_v35 = vadd.f32 %v1450_v12, %v1449_v42  ;;  %v1471_v33 = vrot.slane %v1470_v53, 4 }
 0x728   :  { %v1452_v36 = vrot.slane %v1451_v35, 2  ;;  %v1472_v17 = vadd.f32 %v1471_v33, %v1470_v53 }
 0x72a   :  { %v1453_v60 = vadd.f32 %v1452_v36, %v1451_v35  ;;  %v1473_v61 = vrot.slane %v1472_v17, 2 }
 0x72c   :  { %v1454_v62 = vrot.slane %v1453_v60, 1  ;;  %v1474_v4 = vadd.f32 %v1473_v61, %v1472_v17 }
 0x72e   :  { %v1455_v5 = vadd.f32 %v1454_v62, %v1453_v60  ;;  %v1475_v1 = vrot.slane %v1474_v4, 1 }
 0x730   :  { %v1476_v8 = vadd.f32 %v1475_v1, %v1474_v4  ;;  %v1477_v10 = vmul.f32 0.015625, %v1455_v5 }
 0x732   :  { %v1478_v11 = vmul.f32 0.015625, %v1476_v8  ;;  %v1479_v48 = vmul.f32 %v1477_v10, %v1477_v10 }
 0x734   :  { %v1480_v0 = vsub.f32 %v1478_v11, %v1479_v48 }
 0x736   :  { %v1481_v45 = vmax.f32 %v1480_v0, 0.0 }
 0x738   :  { %v1482_v22 = vadd.f32 1e-05, %v1481_v45 }
 0x73a   :  { %1888 = vrsqrt.f32 %v1482_v22 }
 0x747   :  { %v1889_v40 = vpop.eup %1888 }
 0x748   :  { %v1484_v30 = vmul.f32 %v1889_v40, %v1441_v13 }
 0x74a   :  { %v1485_v49 = vmul.f32 %v1484_v30, %v1477_v10  ;;  %v1490_v63 = vrot.slane %v1484_v30, %v2068_v18 }
 0x74c   :  { %v1486_v24 = vsub.f32 %v1442_v37, %v1485_v49  ;;  %v1491_v31 = vmul.f32 %v1490_v63, %v1410_v55  ;;  %v1492_v32 = vmul.f32 %v1490_v63, %v1413_v28  ;;  %v1493_v52 = vmul.f32 %v1816_v25, %v1490_v63 }
 0x74d   :  { %v1494_v2 = vmul.f32 %v1817_v27, %v1490_v63  ;;  %v1495_v38 = vmul.f32 %v1490_v63, %v1426_v21  ;;  %v1496_v3 = vmul.f32 %v1490_v63, %v1429_v9  ;;  %v1497_v44 = vmul.f32 %v1820_v54, %v1490_v63 }
 0x74e   :  { %v1498_v58 = vmul.f32 %v1821_v47, %v1490_v63  ;;  %v1499_v56 = vadd.f32 %v1491_v31, %v2196_v46  ;;  %v1500_v59 = vadd.f32 %v1492_v32, %v2198_v19  ;;  %v1501_v39 = vadd.f32 %v1493_v52, %v2202_v50 }
 0x74f   :  { %v1502_v15 = vadd.f32 %v1494_v2, %v2204_v57  ;;  %v1503_v23 = vadd.f32 %v1495_v38, %v2206_v51  ;;  %v1504_v14 = vadd.f32 %v1496_v3, %v2200_v20  ;;  %v1505_v55 = vadd.f32 %v1497_v44, %v2216_v29 }
 0x750   :  { %v1506_v25 = vadd.f32 %v1498_v58, %v2218_v34  ;;  %v1510_v27 = vrot.slane %v1486_v24, %v2068_v18 }
 0x752   :  { %v1511_v28 = vadd.f32 %v1510_v27, %v1499_v56  ;;  %v1512_v54 = vadd.f32 %v1510_v27, %v1500_v59  ;;  %v1513_v21 = vadd.f32 %v1510_v27, %v1501_v39  ;;  %v1514_v46 = vadd.f32 %v1510_v27, %v1502_v15 }
 0x753   :  { %v1515_v47 = vadd.f32 %v1510_v27, %v1503_v23  ;;  %v1516_v19 = vadd.f32 %v1510_v27, %v1504_v14  ;;  %v1517_v9 = vadd.f32 %v1510_v27, %v1505_v55  ;;  %v1518_v50 = vadd.f32 %v1510_v27, %v1506_v25 }
 0x754   :  { %1519 = vst [vmem:[%s2282_s6] sm:$0xff] %v1511_v28  ;;  %1520 = vst [vmem:[%s2282_s6 + $0x8] sm:$0xff] %v1512_v54 }
 0x755   :  { %1521 = vst [vmem:[%s2282_s6 + $0x10] sm:$0xff] %v1513_v21  ;;  %1522 = vst [vmem:[%s2282_s6 + $0x18] sm:$0xff] %v1514_v46 }
 0x756   :  { %1523 = vst [vmem:[%s2282_s6 + $0x20] sm:$0xff] %v1515_v47  ;;  %1524 = vst [vmem:[%s2282_s6 + $0x28] sm:$0xff] %v1516_v19 }
 0x757   :  { %1525 = vst [vmem:[%s2282_s6 + $0x30] sm:$0xff] %v1517_v9  ;;  %1526 = vst [vmem:[%s2282_s6 + $0x38] sm:$0xff] %v1518_v50 }
 0x758   :  { %1531 = vsyncpa [#allocation3], 1 }
 0x759   :  { %1532 = vsyncpa [#allocation5], 1 }

</bundles_post_ra>
